<compile_context>
chip_gen: v6e
topology: v6e:2x2x1
jax: 0.10.0
libtpu: 0.0.40
codegen_flags: <defaults>
</compile_context>

<pallas_src>
import functools

import jax
import jax.numpy as jnp
from jax import lax
from jax.experimental import pallas as pl
from jax.experimental.pallas import tpu as pltpu

INPUT_SIZE = 46
HIDDEN_SIZE = 64
NUM_CLASSES = 8


def _round_up(x, m):
    return (x + m - 1) // m * m


def _cdiv(a, b):
    return (a + b - 1) // b


def _sigmoid(x):
    # tanh-based sigmoid: EUP-friendly, no exp-overflow, no divide.
    return 0.5 * (jnp.tanh(0.5 * x) + 1.0)


def _use_bf16_acts():
    # v6e / v7x have a bf16 EUP/VPU path (~2x transcendental throughput).
    # v5e and older do not — casting there would only add VPU work.
    try:
        kind = jax.devices()[0].device_kind.lower()
    except Exception:
        return False
    return ("v6" in kind) or ("v7" in kind)


def bilstm_kernel(x_ref, wih_f_ref, whh_f_ref, b_f_ref,
                  wih_b_ref, b_b_ref, w_fc_ref, b_fc_ref,
                  o_ref, xg_ref, *, bf16_acts):
    # x_ref  : (T, Bt, IN_P)  bf16   full sequence for this batch tile
    # wih_*  : (IN_P, 4H)     bf16   gate columns permuted to (i, f, o, g)
    # whh_f  : (H, 4H)        bf16
    # b_*    : (1, 4H)        f32
    # w_fc   : (2H, C) bf16 ; b_fc : (1, C) f32
    # o_ref  : (Bt, C)        f32
    # xg_ref : (T, Bt, 4H)    f32 VMEM scratch — precomputed input gates (+ bias)
    T, Bt, IN_P = x_ref.shape
    H = whh_f_ref.shape[0]
    G = 4 * H
    act_dt = jnp.bfloat16 if bf16_acts else jnp.float32

    # ---- Hoisted input projection: ONE big MXU matmul over all timesteps ----
    # (T*Bt, IN_P) @ (IN_P, 4H), bias folded in once.  Both reshapes are layout
    # preserving (Bt is a multiple of 8), so the per-step xg_ref[t] loads below
    # are dense full-tile loads.
    x_all = x_ref[...].reshape(T * Bt, IN_P)
    xg = jnp.dot(x_all, wih_f_ref[...], preferred_element_type=jnp.float32)
    xg_ref[...] = (xg + b_f_ref[...]).reshape(T, Bt, G)

    whh_f = whh_f_ref[...]     # stays VMEM/vreg resident across the recurrence

    def activations(gates):
        g = gates.astype(act_dt)
        sig = _sigmoid(g[:, 0:3 * H])          # (i, f, o) in one contiguous slab
        i_g = sig[:, 0:H]
        f_g = sig[:, H:2 * H]
        o_g = sig[:, 2 * H:3 * H]
        g_g = jnp.tanh(g[:, 3 * H:4 * H])      # cell-candidate gate
        return i_g, f_g, o_g, g_g

    # ---- Forward recurrence over the full sequence (serial, T is small) ----
    h0 = jnp.zeros((Bt, H), jnp.bfloat16)      # h kept in bf16 (MXU operand dtype)
    c0 = jnp.zeros((Bt, H), jnp.float32)       # c kept in f32

    def fwd_step(t, carry):
        h, c = carry
        # Single K=H matmul on the serial critical path; gates already hold x@W_ih + b.
        gates = xg_ref[t] + jnp.dot(h, whh_f, preferred_element_type=jnp.float32)
        i_g, f_g, o_g, g_g = activations(gates)
        c_new = f_g.astype(jnp.float32) * c + (i_g * g_g).astype(jnp.float32)
        h_new = (o_g.astype(jnp.float32) * jnp.tanh(c_new)).astype(jnp.bfloat16)
        return h_new, c_new

    h_fwd, _ = lax.fori_loop(0, T, fwd_step, (h0, c0), unroll=True)

    # ---- Reverse direction ----
    # r_out[-1][:, H:] is the reverse LSTM's output at time T-1 == exactly ONE
    # reverse cell step on x[T-1] from zero state, so the recurrent term
    # h0 @ W_hh_b and f*c0 both vanish (W_hh_b is not needed at all).
    # Matches PyTorch's r_out[-1]; NOT valid for any other timestep.
    gates_b = (jnp.dot(x_ref[T - 1], wih_b_ref[...],
                       preferred_element_type=jnp.float32) + b_b_ref[...])
    i_b, _, o_b, g_b = activations(gates_b)
    c_b = (i_b * g_b).astype(jnp.float32)
    h_bwd = (o_b.astype(jnp.float32) * jnp.tanh(c_b)).astype(jnp.bfloat16)

    # ---- fc on concat(h_fwd, h_bwd): split the (2H, C) weight statically ----
    logits = (jnp.dot(h_fwd, w_fc_ref[0:H, :], preferred_element_type=jnp.float32)
              + jnp.dot(h_bwd, w_fc_ref[H:2 * H, :], preferred_element_type=jnp.float32)
              + b_fc_ref[...])

    # ---- Softmax over classes (dim=1), f32, EUP reciprocal ----
    m = jnp.max(logits, axis=-1, keepdims=True)
    e = jnp.exp(logits - m)
    denom = jnp.sum(e, axis=-1, keepdims=True)
    o_ref[...] = (e * pl.reciprocal(denom, approx=True)).astype(o_ref.dtype)


def _permute_gates(w, axis):
    # PyTorch LSTM gate order is (i, f, g, o); regroup columns to (i, f, o, g) so
    # all sigmoid gates are contiguous and tanh applies only to the last slab.
    i, f, g, o = jnp.split(w, 4, axis=axis)
    return jnp.concatenate([i, f, o, g], axis=axis)


def bilstm_forward(x, params, tile_b=1024):
    """x: (batch, seq, INPUT_SIZE), same as the PyTorch module input (pre-transpose)."""
    (w_ih_f, w_hh_f, b_f, w_ih_b, w_hh_b, b_b, w_fc, b_fc) = params
    del w_hh_b  # reverse half of r_out[-1] starts from zero state -> recurrent term == 0
    B, T, IN = x.shape
    H = HIDDEN_SIZE
    IN_P = _round_up(IN, 8)          # 46 -> 48: unmasked K-dim feed for the MXU

    # --- weight prep (tiny) ---
    w_ih_f = _permute_gates(w_ih_f, 1)
    w_hh_f = _permute_gates(w_hh_f, 1)
    b_f = _permute_gates(b_f, 1).astype(jnp.float32)
    w_ih_b = _permute_gates(w_ih_b, 1)
    b_b = _permute_gates(b_b, 1).astype(jnp.float32)
    if IN_P != IN:
        w_ih_f = jnp.pad(w_ih_f, ((0, IN_P - IN), (0, 0)))
        w_ih_b = jnp.pad(w_ih_b, ((0, IN_P - IN), (0, 0)))
    to_bf16 = lambda a: a.astype(jnp.bfloat16)
    w_ih_f, w_hh_f, w_ih_b, w_fc16 = map(to_bf16, (w_ih_f, w_hh_f, w_ih_b, w_fc))
    b_fc = b_fc.astype(jnp.float32)

    # --- batch tiling: minimize padding waste; keep >=2 grid steps when the batch
    # allows so dimension_semantics=('parallel',) can shard across v7x's two TCs.
    n_tiles = _cdiv(B, tile_b)
    if n_tiles == 1 and B >= 64:
        n_tiles = 2
    tb = _round_up(_cdiv(B, n_tiles), 16)
    Bp = _round_up(B, tb)
    grid = (Bp // tb,)

    # --- x prep: (B,T,IN) -> (T,Bp,IN_P) bf16 in one fused pass (see header note).
    xt = jnp.transpose(x, (1, 0, 2))
    xt = jnp.pad(xt, ((0, 0), (0, Bp - B), (0, IN_P - IN))).astype(jnp.bfloat16)

    kernel = functools.partial(bilstm_kernel, bf16_acts=_use_bf16_acts())
    full2d = lambda a: pl.BlockSpec(a.shape, lambda i: (0, 0))

    out = pl.pallas_call(
        kernel,
        out_shape=jax.ShapeDtypeStruct((Bp, NUM_CLASSES), jnp.float32),
        grid=grid,
        in_specs=[
            pl.BlockSpec((T, tb, IN_P), lambda i: (0, i, 0)),   # x: full seq, batch slice
            full2d(w_ih_f), full2d(w_hh_f), full2d(b_f),        # forward weights (resident)
            full2d(w_ih_b), full2d(b_b),                        # reverse (single step)
            full2d(w_fc16), full2d(b_fc),
        ],
        out_specs=pl.BlockSpec((tb, NUM_CLASSES), lambda i: (i, 0)),
        scratch_shapes=[pltpu.VMEM((T, tb, 4 * H), jnp.float32)],
        compiler_params=pltpu.CompilerParams(
            dimension_semantics=("parallel",),        # megacore-shardable on v7x
            vmem_limit_bytes=32 * 1024 * 1024),       # f32 gate scratch @ tb=1024 ≈ 8 MiB;
                                                      # above v5e's 16 MiB default, well
                                                      # under v7x's 64 MiB physical VMEM.
    )(xt, w_ih_f, w_hh_f, b_f, w_ih_b, b_b, w_fc16, b_fc)
    return out[:B]


def init_params(key):
    """Deterministic init mimicking PyTorch nn.LSTM / nn.Linear U(-1/sqrt(fan), 1/sqrt(fan)).
    Weights stored transposed vs PyTorch ((in, 4H) / (2H, C)) so kernels compute x @ W.
    Gate order: i, f, g, o (PyTorch convention). Biases pre-summed (b_ih + b_hh)."""
    ks = jax.random.split(key, 10)
    k = 1.0 / (HIDDEN_SIZE ** 0.5)
    u = lambda kk, shape, bound: jax.random.uniform(kk, shape, jnp.float32, -bound, bound)

    w_ih_f = u(ks[0], (INPUT_SIZE, 4 * HIDDEN_SIZE), k)
    w_hh_f = u(ks[1], (HIDDEN_SIZE, 4 * HIDDEN_SIZE), k)
    b_f = u(ks[2], (1, 4 * HIDDEN_SIZE), k) + u(ks[3], (1, 4 * HIDDEN_SIZE), k)

    w_ih_b = u(ks[4], (INPUT_SIZE, 4 * HIDDEN_SIZE), k)
    w_hh_b = u(ks[5], (HIDDEN_SIZE, 4 * HIDDEN_SIZE), k)
    b_b = u(ks[6], (1, 4 * HIDDEN_SIZE), k) + u(ks[7], (1, 4 * HIDDEN_SIZE), k)

    kf = 1.0 / ((2 * HIDDEN_SIZE) ** 0.5)
    w_fc = u(ks[8], (2 * HIDDEN_SIZE, NUM_CLASSES), kf)
    b_fc = u(ks[9], (1, NUM_CLASSES), kf)
    return (w_ih_f, w_hh_f, b_f, w_ih_b, w_hh_b, b_b, w_fc, b_fc)


def bilstm_reference(x, params):
    """Pure-JAX full bidirectional LSTM reference (both directions over the whole
    sequence), matching PyTorch semantics: probs = softmax(fc(r_out[-1]))."""
    (w_ih_f, w_hh_f, b_f, w_ih_b, w_hh_b, b_b, w_fc, b_fc) = params
    H = HIDDEN_SIZE
    B = x.shape[0]
    xt = jnp.transpose(x, (1, 0, 2))  # (T, B, IN)

    def make_step(w_ih, w_hh, b):
        def step(carry, x_t):
            h, c = carry
            g = x_t @ w_ih + h @ w_hh + b
            i = jax.nn.sigmoid(g[:, :H])
            f = jax.nn.sigmoid(g[:, H:2 * H])
            gg = jnp.tanh(g[:, 2 * H:3 * H])
            o = jax.nn.sigmoid(g[:, 3 * H:])
            c = f * c + i * gg
            h = o * jnp.tanh(c)
            return (h, c), h
        return step

    init = (jnp.zeros((B, H), jnp.float32), jnp.zeros((B, H), jnp.float32))
    _, h_f_seq = lax.scan(make_step(w_ih_f, w_hh_f, b_f), init, xt)
    _, h_b_seq = lax.scan(make_step(w_ih_b, w_hh_b, b_b), init, xt[::-1])
    h_b_seq = h_b_seq[::-1]

    r_last = jnp.concatenate([h_f_seq[-1], h_b_seq[-1]], axis=-1)  # r_out[-1]
    logits = r_last @ w_fc + b_fc
    return jax.nn.softmax(logits, axis=1)


if __name__ == "__main__":
    key = jax.random.PRNGKey(0)
    kx, kp = jax.random.split(key)

    B, T = 4, 8
    x = jax.random.normal(kx, (B, T, INPUT_SIZE), jnp.float32)
    params = init_params(kp)

    out = bilstm_forward(x, params)
    out = jax.block_until_ready(out)

    ref = bilstm_reference(x, params)
    assert out.shape == (B, NUM_CLASSES)
    # bf16 matmul operands / bf16 h-state and approx-reciprocal softmax -> loose tolerance.
    assert jnp.allclose(jnp.sum(out, axis=1), 1.0, atol=2e-2), "softmax rows must sum to ~1"
    assert jnp.allclose(out, ref, atol=2e-2), "mismatch vs JAX BiLSTM reference"

    print("KERNEL_OK")
</pallas_src>

<mosaic_0001>
module attributes {stable_mosaic.version = 11 : i64} {
  func.func @bilstm_kernel(%arg0: i32, %arg1: memref<8x16x48xbf16, #tpu.memory_space<vmem>>, %arg2: memref<48x256xbf16, #tpu.memory_space<vmem>>, %arg3: memref<64x256xbf16, #tpu.memory_space<vmem>>, %arg4: memref<1x256xf32, #tpu.memory_space<vmem>>, %arg5: memref<48x256xbf16, #tpu.memory_space<vmem>>, %arg6: memref<1x256xf32, #tpu.memory_space<vmem>>, %arg7: memref<128x8xbf16, #tpu.memory_space<vmem>>, %arg8: memref<1x8xf32, #tpu.memory_space<vmem>>, %arg9: memref<16x8xf32, #tpu.memory_space<vmem>>, %arg10: memref<8x16x256xf32, #tpu.memory_space<vmem>>) attributes {dimension_semantics = [#tpu.dimension_semantics<parallel>], iteration_bounds = array<i64: 1>, scalar_prefetch = 0 : i64, scratch_operands = 1 : i64, tpu.core_type = #tpu.core_type<tc>, window_params = [{transform_indices = @transform_0, window_bounds = array<i64: 8, 16, 48>}, {pipeline_mode = #tpu.pipeline_mode<synchronous>, transform_indices = @transform_1, window_bounds = array<i64: 48, 256>}, {pipeline_mode = #tpu.pipeline_mode<synchronous>, transform_indices = @transform_2, window_bounds = array<i64: 64, 256>}, {pipeline_mode = #tpu.pipeline_mode<synchronous>, transform_indices = @transform_3, window_bounds = array<i64: 1, 256>}, {pipeline_mode = #tpu.pipeline_mode<synchronous>, transform_indices = @transform_4, window_bounds = array<i64: 48, 256>}, {pipeline_mode = #tpu.pipeline_mode<synchronous>, transform_indices = @transform_5, window_bounds = array<i64: 1, 256>}, {pipeline_mode = #tpu.pipeline_mode<synchronous>, transform_indices = @transform_6, window_bounds = array<i64: 128, 8>}, {pipeline_mode = #tpu.pipeline_mode<synchronous>, transform_indices = @transform_7, window_bounds = array<i64: 1, 8>}, {transform_indices = @transform_8, window_bounds = array<i64: 16, 8>}]} {
    %c0 = arith.constant 0 : index
    %c0_0 = arith.constant 0 : index
    %c0_1 = arith.constant 0 : index
    %0 = vector.load %arg1[%c0, %c0_0, %c0_1] : memref<8x16x48xbf16, #tpu.memory_space<vmem>>, vector<8x16x48xbf16>
    %1 = vector.shape_cast %0 : vector<8x16x48xbf16> to vector<128x48xbf16>
    %c0_2 = arith.constant 0 : index
    %c0_3 = arith.constant 0 : index
    %2 = vector.load %arg2[%c0_2, %c0_3] : memref<48x256xbf16, #tpu.memory_space<vmem>>, vector<48x256xbf16>
    %cst = arith.constant dense<0.000000e+00> : vector<128x256xf32>
    %3 = tpu.matmul %1, %2, %cst {dimension_numbers = #tpu.dot_dimension_numbers<[1], [0], [0], [1], [0, 0, 1, 1], [], []>} : vector<128x48xbf16>, vector<48x256xbf16>, vector<128x256xf32> -> vector<128x256xf32>
    %c0_4 = arith.constant 0 : index
    %c0_5 = arith.constant 0 : index
    %4 = vector.load %arg4[%c0_4, %c0_5] : memref<1x256xf32, #tpu.memory_space<vmem>>, vector<1x256xf32>
    %5 = vector.broadcast %4 : vector<1x256xf32> to vector<128x256xf32>
    %6 = arith.addf %3, %5 : vector<128x256xf32>
    %7 = vector.shape_cast %6 : vector<128x256xf32> to vector<8x16x256xf32>
    %c0_6 = arith.constant 0 : index
    %c0_7 = arith.constant 0 : index
    %c0_8 = arith.constant 0 : index
    %8 = vector.load %arg10[%c0_6, %c0_7, %c0_8] : memref<8x16x256xf32, #tpu.memory_space<vmem>>, vector<8x16x256xf32>
    tpu.vector_store %arg10[%c0_6, %c0_7, %c0_8], %7 {strides = array<i32>} : memref<8x16x256xf32, #tpu.memory_space<vmem>>, vector<8x16x256xf32>,
    %c0_9 = arith.constant 0 : index
    %c0_10 = arith.constant 0 : index
    %9 = vector.load %arg3[%c0_9, %c0_10] : memref<64x256xbf16, #tpu.memory_space<vmem>>, vector<64x256xbf16>
    %cst_11 = arith.constant 0.000000e+00 : bf16
    %10 = vector.broadcast %cst_11 : bf16 to vector<16x64xbf16>
    %cst_12 = arith.constant 0.000000e+00 : f32
    %11 = vector.broadcast %cst_12 : f32 to vector<16x64xf32>
    %c0_i32 = arith.constant 0 : i32
    %12 = arith.index_cast %c0_i32 : i32 to index
    %c0_13 = arith.constant 0 : index
    %c0_14 = arith.constant 0 : index
    %13 = vector.load %arg10[%12, %c0_13, %c0_14] : memref<8x16x256xf32, #tpu.memory_space<vmem>>, vector<1x16x256xf32>
    %14 = vector.shape_cast %13 : vector<1x16x256xf32> to vector<16x256xf32>
    %cst_15 = arith.constant dense<0.000000e+00> : vector<16x256xf32>
    %15 = tpu.matmul %10, %9, %cst_15 {dimension_numbers = #tpu.dot_dimension_numbers<[1], [0], [0], [1], [0, 0, 1, 1], [], []>} : vector<16x64xbf16>, vector<64x256xbf16>, vector<16x256xf32> -> vector<16x256xf32>
    %16 = arith.addf %14, %15 : vector<16x256xf32>
    %17 = vector.extract_strided_slice %16 {offsets = [0, 0], sizes = [16, 192], strides = [1, 1]} : vector<16x256xf32> to vector<16x192xf32>
    %cst_16 = arith.constant 5.000000e-01 : f32
    %18 = vector.broadcast %cst_16 : f32 to vector<16x192xf32>
    %19 = arith.mulf %18, %17 : vector<16x192xf32>
    %20 = math.tanh %19 : vector<16x192xf32>
    %cst_17 = arith.constant 1.000000e+00 : f32
    %21 = vector.broadcast %cst_17 : f32 to vector<16x192xf32>
    %22 = arith.addf %20, %21 : vector<16x192xf32>
    %cst_18 = arith.constant 5.000000e-01 : f32
    %23 = vector.broadcast %cst_18 : f32 to vector<16x192xf32>
    %24 = arith.mulf %23, %22 : vector<16x192xf32>
    %25 = vector.extract_strided_slice %24 {offsets = [0, 0], sizes = [16, 64], strides = [1, 1]} : vector<16x192xf32> to vector<16x64xf32>
    %26 = vector.extract_strided_slice %24 {offsets = [0, 64], sizes = [16, 64], strides = [1, 1]} : vector<16x192xf32> to vector<16x64xf32>
    %27 = vector.extract_strided_slice %24 {offsets = [0, 128], sizes = [16, 64], strides = [1, 1]} : vector<16x192xf32> to vector<16x64xf32>
    %28 = vector.extract_strided_slice %16 {offsets = [0, 192], sizes = [16, 64], strides = [1, 1]} : vector<16x256xf32> to vector<16x64xf32>
    %29 = math.tanh %28 : vector<16x64xf32>
    %30 = arith.mulf %26, %11 : vector<16x64xf32>
    %31 = arith.mulf %25, %29 : vector<16x64xf32>
    %32 = arith.addf %30, %31 : vector<16x64xf32>
    %33 = math.tanh %32 : vector<16x64xf32>
    %34 = arith.mulf %27, %33 : vector<16x64xf32>
    %35 = arith.truncf %34 : vector<16x64xf32> to vector<16x64xbf16>
    %c1_i32 = arith.constant 1 : i32
    %36 = arith.index_cast %c1_i32 : i32 to index
    %c0_19 = arith.constant 0 : index
    %c0_20 = arith.constant 0 : index
    %37 = vector.load %arg10[%36, %c0_19, %c0_20] : memref<8x16x256xf32, #tpu.memory_space<vmem>>, vector<1x16x256xf32>
    %38 = vector.shape_cast %37 : vector<1x16x256xf32> to vector<16x256xf32>
    %cst_21 = arith.constant dense<0.000000e+00> : vector<16x256xf32>
    %39 = tpu.matmul %35, %9, %cst_21 {dimension_numbers = #tpu.dot_dimension_numbers<[1], [0], [0], [1], [0, 0, 1, 1], [], []>} : vector<16x64xbf16>, vector<64x256xbf16>, vector<16x256xf32> -> vector<16x256xf32>
    %40 = arith.addf %38, %39 : vector<16x256xf32>
    %41 = vector.extract_strided_slice %40 {offsets = [0, 0], sizes = [16, 192], strides = [1, 1]} : vector<16x256xf32> to vector<16x192xf32>
    %cst_22 = arith.constant 5.000000e-01 : f32
    %42 = vector.broadcast %cst_22 : f32 to vector<16x192xf32>
    %43 = arith.mulf %42, %41 : vector<16x192xf32>
    %44 = math.tanh %43 : vector<16x192xf32>
    %cst_23 = arith.constant 1.000000e+00 : f32
    %45 = vector.broadcast %cst_23 : f32 to vector<16x192xf32>
    %46 = arith.addf %44, %45 : vector<16x192xf32>
    %cst_24 = arith.constant 5.000000e-01 : f32
    %47 = vector.broadcast %cst_24 : f32 to vector<16x192xf32>
    %48 = arith.mulf %47, %46 : vector<16x192xf32>
    %49 = vector.extract_strided_slice %48 {offsets = [0, 0], sizes = [16, 64], strides = [1, 1]} : vector<16x192xf32> to vector<16x64xf32>
    %50 = vector.extract_strided_slice %48 {offsets = [0, 64], sizes = [16, 64], strides = [1, 1]} : vector<16x192xf32> to vector<16x64xf32>
    %51 = vector.extract_strided_slice %48 {offsets = [0, 128], sizes = [16, 64], strides = [1, 1]} : vector<16x192xf32> to vector<16x64xf32>
    %52 = vector.extract_strided_slice %40 {offsets = [0, 192], sizes = [16, 64], strides = [1, 1]} : vector<16x256xf32> to vector<16x64xf32>
    %53 = math.tanh %52 : vector<16x64xf32>
    %54 = arith.mulf %50, %32 : vector<16x64xf32>
    %55 = arith.mulf %49, %53 : vector<16x64xf32>
    %56 = arith.addf %54, %55 : vector<16x64xf32>
    %57 = math.tanh %56 : vector<16x64xf32>
    %58 = arith.mulf %51, %57 : vector<16x64xf32>
    %59 = arith.truncf %58 : vector<16x64xf32> to vector<16x64xbf16>
    %c2_i32 = arith.constant 2 : i32
    %60 = arith.index_cast %c2_i32 : i32 to index
    %c0_25 = arith.constant 0 : index
    %c0_26 = arith.constant 0 : index
    %61 = vector.load %arg10[%60, %c0_25, %c0_26] : memref<8x16x256xf32, #tpu.memory_space<vmem>>, vector<1x16x256xf32>
    %62 = vector.shape_cast %61 : vector<1x16x256xf32> to vector<16x256xf32>
    %cst_27 = arith.constant dense<0.000000e+00> : vector<16x256xf32>
    %63 = tpu.matmul %59, %9, %cst_27 {dimension_numbers = #tpu.dot_dimension_numbers<[1], [0], [0], [1], [0, 0, 1, 1], [], []>} : vector<16x64xbf16>, vector<64x256xbf16>, vector<16x256xf32> -> vector<16x256xf32>
    %64 = arith.addf %62, %63 : vector<16x256xf32>
    %65 = vector.extract_strided_slice %64 {offsets = [0, 0], sizes = [16, 192], strides = [1, 1]} : vector<16x256xf32> to vector<16x192xf32>
    %cst_28 = arith.constant 5.000000e-01 : f32
    %66 = vector.broadcast %cst_28 : f32 to vector<16x192xf32>
    %67 = arith.mulf %66, %65 : vector<16x192xf32>
    %68 = math.tanh %67 : vector<16x192xf32>
    %cst_29 = arith.constant 1.000000e+00 : f32
    %69 = vector.broadcast %cst_29 : f32 to vector<16x192xf32>
    %70 = arith.addf %68, %69 : vector<16x192xf32>
    %cst_30 = arith.constant 5.000000e-01 : f32
    %71 = vector.broadcast %cst_30 : f32 to vector<16x192xf32>
    %72 = arith.mulf %71, %70 : vector<16x192xf32>
    %73 = vector.extract_strided_slice %72 {offsets = [0, 0], sizes = [16, 64], strides = [1, 1]} : vector<16x192xf32> to vector<16x64xf32>
    %74 = vector.extract_strided_slice %72 {offsets = [0, 64], sizes = [16, 64], strides = [1, 1]} : vector<16x192xf32> to vector<16x64xf32>
    %75 = vector.extract_strided_slice %72 {offsets = [0, 128], sizes = [16, 64], strides = [1, 1]} : vector<16x192xf32> to vector<16x64xf32>
    %76 = vector.extract_strided_slice %64 {offsets = [0, 192], sizes = [16, 64], strides = [1, 1]} : vector<16x256xf32> to vector<16x64xf32>
    %77 = math.tanh %76 : vector<16x64xf32>
    %78 = arith.mulf %74, %56 : vector<16x64xf32>
    %79 = arith.mulf %73, %77 : vector<16x64xf32>
    %80 = arith.addf %78, %79 : vector<16x64xf32>
    %81 = math.tanh %80 : vector<16x64xf32>
    %82 = arith.mulf %75, %81 : vector<16x64xf32>
    %83 = arith.truncf %82 : vector<16x64xf32> to vector<16x64xbf16>
    %c3_i32 = arith.constant 3 : i32
    %84 = arith.index_cast %c3_i32 : i32 to index
    %c0_31 = arith.constant 0 : index
    %c0_32 = arith.constant 0 : index
    %85 = vector.load %arg10[%84, %c0_31, %c0_32] : memref<8x16x256xf32, #tpu.memory_space<vmem>>, vector<1x16x256xf32>
    %86 = vector.shape_cast %85 : vector<1x16x256xf32> to vector<16x256xf32>
    %cst_33 = arith.constant dense<0.000000e+00> : vector<16x256xf32>
    %87 = tpu.matmul %83, %9, %cst_33 {dimension_numbers = #tpu.dot_dimension_numbers<[1], [0], [0], [1], [0, 0, 1, 1], [], []>} : vector<16x64xbf16>, vector<64x256xbf16>, vector<16x256xf32> -> vector<16x256xf32>
    %88 = arith.addf %86, %87 : vector<16x256xf32>
    %89 = vector.extract_strided_slice %88 {offsets = [0, 0], sizes = [16, 192], strides = [1, 1]} : vector<16x256xf32> to vector<16x192xf32>
    %cst_34 = arith.constant 5.000000e-01 : f32
    %90 = vector.broadcast %cst_34 : f32 to vector<16x192xf32>
    %91 = arith.mulf %90, %89 : vector<16x192xf32>
    %92 = math.tanh %91 : vector<16x192xf32>
    %cst_35 = arith.constant 1.000000e+00 : f32
    %93 = vector.broadcast %cst_35 : f32 to vector<16x192xf32>
    %94 = arith.addf %92, %93 : vector<16x192xf32>
    %cst_36 = arith.constant 5.000000e-01 : f32
    %95 = vector.broadcast %cst_36 : f32 to vector<16x192xf32>
    %96 = arith.mulf %95, %94 : vector<16x192xf32>
    %97 = vector.extract_strided_slice %96 {offsets = [0, 0], sizes = [16, 64], strides = [1, 1]} : vector<16x192xf32> to vector<16x64xf32>
    %98 = vector.extract_strided_slice %96 {offsets = [0, 64], sizes = [16, 64], strides = [1, 1]} : vector<16x192xf32> to vector<16x64xf32>
    %99 = vector.extract_strided_slice %96 {offsets = [0, 128], sizes = [16, 64], strides = [1, 1]} : vector<16x192xf32> to vector<16x64xf32>
    %100 = vector.extract_strided_slice %88 {offsets = [0, 192], sizes = [16, 64], strides = [1, 1]} : vector<16x256xf32> to vector<16x64xf32>
    %101 = math.tanh %100 : vector<16x64xf32>
    %102 = arith.mulf %98, %80 : vector<16x64xf32>
    %103 = arith.mulf %97, %101 : vector<16x64xf32>
    %104 = arith.addf %102, %103 : vector<16x64xf32>
    %105 = math.tanh %104 : vector<16x64xf32>
    %106 = arith.mulf %99, %105 : vector<16x64xf32>
    %107 = arith.truncf %106 : vector<16x64xf32> to vector<16x64xbf16>
    %c4_i32 = arith.constant 4 : i32
    %108 = arith.index_cast %c4_i32 : i32 to index
    %c0_37 = arith.constant 0 : index
    %c0_38 = arith.constant 0 : index
    %109 = vector.load %arg10[%108, %c0_37, %c0_38] : memref<8x16x256xf32, #tpu.memory_space<vmem>>, vector<1x16x256xf32>
    %110 = vector.shape_cast %109 : vector<1x16x256xf32> to vector<16x256xf32>
    %cst_39 = arith.constant dense<0.000000e+00> : vector<16x256xf32>
    %111 = tpu.matmul %107, %9, %cst_39 {dimension_numbers = #tpu.dot_dimension_numbers<[1], [0], [0], [1], [0, 0, 1, 1], [], []>} : vector<16x64xbf16>, vector<64x256xbf16>, vector<16x256xf32> -> vector<16x256xf32>
    %112 = arith.addf %110, %111 : vector<16x256xf32>
    %113 = vector.extract_strided_slice %112 {offsets = [0, 0], sizes = [16, 192], strides = [1, 1]} : vector<16x256xf32> to vector<16x192xf32>
    %cst_40 = arith.constant 5.000000e-01 : f32
    %114 = vector.broadcast %cst_40 : f32 to vector<16x192xf32>
    %115 = arith.mulf %114, %113 : vector<16x192xf32>
    %116 = math.tanh %115 : vector<16x192xf32>
    %cst_41 = arith.constant 1.000000e+00 : f32
    %117 = vector.broadcast %cst_41 : f32 to vector<16x192xf32>
    %118 = arith.addf %116, %117 : vector<16x192xf32>
    %cst_42 = arith.constant 5.000000e-01 : f32
    %119 = vector.broadcast %cst_42 : f32 to vector<16x192xf32>
    %120 = arith.mulf %119, %118 : vector<16x192xf32>
    %121 = vector.extract_strided_slice %120 {offsets = [0, 0], sizes = [16, 64], strides = [1, 1]} : vector<16x192xf32> to vector<16x64xf32>
    %122 = vector.extract_strided_slice %120 {offsets = [0, 64], sizes = [16, 64], strides = [1, 1]} : vector<16x192xf32> to vector<16x64xf32>
    %123 = vector.extract_strided_slice %120 {offsets = [0, 128], sizes = [16, 64], strides = [1, 1]} : vector<16x192xf32> to vector<16x64xf32>
    %124 = vector.extract_strided_slice %112 {offsets = [0, 192], sizes = [16, 64], strides = [1, 1]} : vector<16x256xf32> to vector<16x64xf32>
    %125 = math.tanh %124 : vector<16x64xf32>
    %126 = arith.mulf %122, %104 : vector<16x64xf32>
    %127 = arith.mulf %121, %125 : vector<16x64xf32>
    %128 = arith.addf %126, %127 : vector<16x64xf32>
    %129 = math.tanh %128 : vector<16x64xf32>
    %130 = arith.mulf %123, %129 : vector<16x64xf32>
    %131 = arith.truncf %130 : vector<16x64xf32> to vector<16x64xbf16>
    %c5_i32 = arith.constant 5 : i32
    %132 = arith.index_cast %c5_i32 : i32 to index
    %c0_43 = arith.constant 0 : index
    %c0_44 = arith.constant 0 : index
    %133 = vector.load %arg10[%132, %c0_43, %c0_44] : memref<8x16x256xf32, #tpu.memory_space<vmem>>, vector<1x16x256xf32>
    %134 = vector.shape_cast %133 : vector<1x16x256xf32> to vector<16x256xf32>
    %cst_45 = arith.constant dense<0.000000e+00> : vector<16x256xf32>
    %135 = tpu.matmul %131, %9, %cst_45 {dimension_numbers = #tpu.dot_dimension_numbers<[1], [0], [0], [1], [0, 0, 1, 1], [], []>} : vector<16x64xbf16>, vector<64x256xbf16>, vector<16x256xf32> -> vector<16x256xf32>
    %136 = arith.addf %134, %135 : vector<16x256xf32>
    %137 = vector.extract_strided_slice %136 {offsets = [0, 0], sizes = [16, 192], strides = [1, 1]} : vector<16x256xf32> to vector<16x192xf32>
    %cst_46 = arith.constant 5.000000e-01 : f32
    %138 = vector.broadcast %cst_46 : f32 to vector<16x192xf32>
    %139 = arith.mulf %138, %137 : vector<16x192xf32>
    %140 = math.tanh %139 : vector<16x192xf32>
    %cst_47 = arith.constant 1.000000e+00 : f32
    %141 = vector.broadcast %cst_47 : f32 to vector<16x192xf32>
    %142 = arith.addf %140, %141 : vector<16x192xf32>
    %cst_48 = arith.constant 5.000000e-01 : f32
    %143 = vector.broadcast %cst_48 : f32 to vector<16x192xf32>
    %144 = arith.mulf %143, %142 : vector<16x192xf32>
    %145 = vector.extract_strided_slice %144 {offsets = [0, 0], sizes = [16, 64], strides = [1, 1]} : vector<16x192xf32> to vector<16x64xf32>
    %146 = vector.extract_strided_slice %144 {offsets = [0, 64], sizes = [16, 64], strides = [1, 1]} : vector<16x192xf32> to vector<16x64xf32>
    %147 = vector.extract_strided_slice %144 {offsets = [0, 128], sizes = [16, 64], strides = [1, 1]} : vector<16x192xf32> to vector<16x64xf32>
    %148 = vector.extract_strided_slice %136 {offsets = [0, 192], sizes = [16, 64], strides = [1, 1]} : vector<16x256xf32> to vector<16x64xf32>
    %149 = math.tanh %148 : vector<16x64xf32>
    %150 = arith.mulf %146, %128 : vector<16x64xf32>
    %151 = arith.mulf %145, %149 : vector<16x64xf32>
    %152 = arith.addf %150, %151 : vector<16x64xf32>
    %153 = math.tanh %152 : vector<16x64xf32>
    %154 = arith.mulf %147, %153 : vector<16x64xf32>
    %155 = arith.truncf %154 : vector<16x64xf32> to vector<16x64xbf16>
    %c6_i32 = arith.constant 6 : i32
    %156 = arith.index_cast %c6_i32 : i32 to index
    %c0_49 = arith.constant 0 : index
    %c0_50 = arith.constant 0 : index
    %157 = vector.load %arg10[%156, %c0_49, %c0_50] : memref<8x16x256xf32, #tpu.memory_space<vmem>>, vector<1x16x256xf32>
    %158 = vector.shape_cast %157 : vector<1x16x256xf32> to vector<16x256xf32>
    %cst_51 = arith.constant dense<0.000000e+00> : vector<16x256xf32>
    %159 = tpu.matmul %155, %9, %cst_51 {dimension_numbers = #tpu.dot_dimension_numbers<[1], [0], [0], [1], [0, 0, 1, 1], [], []>} : vector<16x64xbf16>, vector<64x256xbf16>, vector<16x256xf32> -> vector<16x256xf32>
    %160 = arith.addf %158, %159 : vector<16x256xf32>
    %161 = vector.extract_strided_slice %160 {offsets = [0, 0], sizes = [16, 192], strides = [1, 1]} : vector<16x256xf32> to vector<16x192xf32>
    %cst_52 = arith.constant 5.000000e-01 : f32
    %162 = vector.broadcast %cst_52 : f32 to vector<16x192xf32>
    %163 = arith.mulf %162, %161 : vector<16x192xf32>
    %164 = math.tanh %163 : vector<16x192xf32>
    %cst_53 = arith.constant 1.000000e+00 : f32
    %165 = vector.broadcast %cst_53 : f32 to vector<16x192xf32>
    %166 = arith.addf %164, %165 : vector<16x192xf32>
    %cst_54 = arith.constant 5.000000e-01 : f32
    %167 = vector.broadcast %cst_54 : f32 to vector<16x192xf32>
    %168 = arith.mulf %167, %166 : vector<16x192xf32>
    %169 = vector.extract_strided_slice %168 {offsets = [0, 0], sizes = [16, 64], strides = [1, 1]} : vector<16x192xf32> to vector<16x64xf32>
    %170 = vector.extract_strided_slice %168 {offsets = [0, 64], sizes = [16, 64], strides = [1, 1]} : vector<16x192xf32> to vector<16x64xf32>
    %171 = vector.extract_strided_slice %168 {offsets = [0, 128], sizes = [16, 64], strides = [1, 1]} : vector<16x192xf32> to vector<16x64xf32>
    %172 = vector.extract_strided_slice %160 {offsets = [0, 192], sizes = [16, 64], strides = [1, 1]} : vector<16x256xf32> to vector<16x64xf32>
    %173 = math.tanh %172 : vector<16x64xf32>
    %174 = arith.mulf %170, %152 : vector<16x64xf32>
    %175 = arith.mulf %169, %173 : vector<16x64xf32>
    %176 = arith.addf %174, %175 : vector<16x64xf32>
    %177 = math.tanh %176 : vector<16x64xf32>
    %178 = arith.mulf %171, %177 : vector<16x64xf32>
    %179 = arith.truncf %178 : vector<16x64xf32> to vector<16x64xbf16>
    %c7_i32 = arith.constant 7 : i32
    %180 = arith.index_cast %c7_i32 : i32 to index
    %c0_55 = arith.constant 0 : index
    %c0_56 = arith.constant 0 : index
    %181 = vector.load %arg10[%180, %c0_55, %c0_56] : memref<8x16x256xf32, #tpu.memory_space<vmem>>, vector<1x16x256xf32>
    %182 = vector.shape_cast %181 : vector<1x16x256xf32> to vector<16x256xf32>
    %cst_57 = arith.constant dense<0.000000e+00> : vector<16x256xf32>
    %183 = tpu.matmul %179, %9, %cst_57 {dimension_numbers = #tpu.dot_dimension_numbers<[1], [0], [0], [1], [0, 0, 1, 1], [], []>} : vector<16x64xbf16>, vector<64x256xbf16>, vector<16x256xf32> -> vector<16x256xf32>
    %184 = arith.addf %182, %183 : vector<16x256xf32>
    %185 = vector.extract_strided_slice %184 {offsets = [0, 0], sizes = [16, 192], strides = [1, 1]} : vector<16x256xf32> to vector<16x192xf32>
    %cst_58 = arith.constant 5.000000e-01 : f32
    %186 = vector.broadcast %cst_58 : f32 to vector<16x192xf32>
    %187 = arith.mulf %186, %185 : vector<16x192xf32>
    %188 = math.tanh %187 : vector<16x192xf32>
    %cst_59 = arith.constant 1.000000e+00 : f32
    %189 = vector.broadcast %cst_59 : f32 to vector<16x192xf32>
    %190 = arith.addf %188, %189 : vector<16x192xf32>
    %cst_60 = arith.constant 5.000000e-01 : f32
    %191 = vector.broadcast %cst_60 : f32 to vector<16x192xf32>
    %192 = arith.mulf %191, %190 : vector<16x192xf32>
    %193 = vector.extract_strided_slice %192 {offsets = [0, 0], sizes = [16, 64], strides = [1, 1]} : vector<16x192xf32> to vector<16x64xf32>
    %194 = vector.extract_strided_slice %192 {offsets = [0, 64], sizes = [16, 64], strides = [1, 1]} : vector<16x192xf32> to vector<16x64xf32>
    %195 = vector.extract_strided_slice %192 {offsets = [0, 128], sizes = [16, 64], strides = [1, 1]} : vector<16x192xf32> to vector<16x64xf32>
    %196 = vector.extract_strided_slice %184 {offsets = [0, 192], sizes = [16, 64], strides = [1, 1]} : vector<16x256xf32> to vector<16x64xf32>
    %197 = math.tanh %196 : vector<16x64xf32>
    %198 = arith.mulf %194, %176 : vector<16x64xf32>
    %199 = arith.mulf %193, %197 : vector<16x64xf32>
    %200 = arith.addf %198, %199 : vector<16x64xf32>
    %201 = math.tanh %200 : vector<16x64xf32>
    %202 = arith.mulf %195, %201 : vector<16x64xf32>
    %203 = arith.truncf %202 : vector<16x64xf32> to vector<16x64xbf16>
    %c8_i32 = arith.constant 8 : i32
    %c7 = arith.constant 7 : index
    %c0_61 = arith.constant 0 : index
    %c0_62 = arith.constant 0 : index
    %204 = vector.load %arg1[%c7, %c0_61, %c0_62] : memref<8x16x48xbf16, #tpu.memory_space<vmem>>, vector<1x16x48xbf16>
    %205 = vector.shape_cast %204 : vector<1x16x48xbf16> to vector<16x48xbf16>
    %c0_63 = arith.constant 0 : index
    %c0_64 = arith.constant 0 : index
    %206 = vector.load %arg5[%c0_63, %c0_64] : memref<48x256xbf16, #tpu.memory_space<vmem>>, vector<48x256xbf16>
    %cst_65 = arith.constant dense<0.000000e+00> : vector<16x256xf32>
    %207 = tpu.matmul %205, %206, %cst_65 {dimension_numbers = #tpu.dot_dimension_numbers<[1], [0], [0], [1], [0, 0, 1, 1], [], []>} : vector<16x48xbf16>, vector<48x256xbf16>, vector<16x256xf32> -> vector<16x256xf32>
    %c0_66 = arith.constant 0 : index
    %c0_67 = arith.constant 0 : index
    %208 = vector.load %arg6[%c0_66, %c0_67] : memref<1x256xf32, #tpu.memory_space<vmem>>, vector<1x256xf32>
    %209 = vector.broadcast %208 : vector<1x256xf32> to vector<16x256xf32>
    %210 = arith.addf %207, %209 : vector<16x256xf32>
    %211 = vector.extract_strided_slice %210 {offsets = [0, 0], sizes = [16, 192], strides = [1, 1]} : vector<16x256xf32> to vector<16x192xf32>
    %cst_68 = arith.constant 5.000000e-01 : f32
    %212 = vector.broadcast %cst_68 : f32 to vector<16x192xf32>
    %213 = arith.mulf %212, %211 : vector<16x192xf32>
    %214 = math.tanh %213 : vector<16x192xf32>
    %cst_69 = arith.constant 1.000000e+00 : f32
    %215 = vector.broadcast %cst_69 : f32 to vector<16x192xf32>
    %216 = arith.addf %214, %215 : vector<16x192xf32>
    %cst_70 = arith.constant 5.000000e-01 : f32
    %217 = vector.broadcast %cst_70 : f32 to vector<16x192xf32>
    %218 = arith.mulf %217, %216 : vector<16x192xf32>
    %219 = vector.extract_strided_slice %218 {offsets = [0, 0], sizes = [16, 64], strides = [1, 1]} : vector<16x192xf32> to vector<16x64xf32>
    %220 = vector.extract_strided_slice %218 {offsets = [0, 128], sizes = [16, 64], strides = [1, 1]} : vector<16x192xf32> to vector<16x64xf32>
    %221 = vector.extract_strided_slice %210 {offsets = [0, 192], sizes = [16, 64], strides = [1, 1]} : vector<16x256xf32> to vector<16x64xf32>
    %222 = math.tanh %221 : vector<16x64xf32>
    %223 = arith.mulf %219, %222 : vector<16x64xf32>
    %224 = math.tanh %223 : vector<16x64xf32>
    %225 = arith.mulf %220, %224 : vector<16x64xf32>
    %226 = arith.truncf %225 : vector<16x64xf32> to vector<16x64xbf16>
    %c0_71 = arith.constant 0 : index
    %c0_72 = arith.constant 0 : index
    %227 = vector.load %arg7[%c0_71, %c0_72] : memref<128x8xbf16, #tpu.memory_space<vmem>>, vector<64x8xbf16>
    %cst_73 = arith.constant dense<0.000000e+00> : vector<16x8xf32>
    %228 = tpu.matmul %203, %227, %cst_73 {dimension_numbers = #tpu.dot_dimension_numbers<[1], [0], [0], [1], [0, 0, 1, 1], [], []>} : vector<16x64xbf16>, vector<64x8xbf16>, vector<16x8xf32> -> vector<16x8xf32>
    %c64 = arith.constant 64 : index
    %c0_74 = arith.constant 0 : index
    %229 = vector.load %arg7[%c64, %c0_74] : memref<128x8xbf16, #tpu.memory_space<vmem>>, vector<64x8xbf16>
    %cst_75 = arith.constant dense<0.000000e+00> : vector<16x8xf32>
    %230 = tpu.matmul %226, %229, %cst_75 {dimension_numbers = #tpu.dot_dimension_numbers<[1], [0], [0], [1], [0, 0, 1, 1], [], []>} : vector<16x64xbf16>, vector<64x8xbf16>, vector<16x8xf32> -> vector<16x8xf32>
    %231 = arith.addf %228, %230 : vector<16x8xf32>
    %c0_76 = arith.constant 0 : index
    %c0_77 = arith.constant 0 : index
    %232 = vector.load %arg8[%c0_76, %c0_77] : memref<1x8xf32, #tpu.memory_space<vmem>>, vector<1x8xf32>
    %233 = vector.broadcast %232 : vector<1x8xf32> to vector<16x8xf32>
    %234 = arith.addf %231, %233 : vector<16x8xf32>
    %cst_78 = arith.constant dense<0xFF800000> : vector<16xf32>
    %235 = vector.multi_reduction <maximumf>, %234, %cst_78 [1] : vector<16x8xf32> to vector<16xf32>
    %236 = vector.shape_cast %235 : vector<16xf32> to vector<16x1xf32>
    %237 = vector.broadcast %236 : vector<16x1xf32> to vector<16x8xf32>
    %238 = arith.subf %234, %237 : vector<16x8xf32>
    %239 = math.exp %238 : vector<16x8xf32>
    %cst_79 = arith.constant dense<0.000000e+00> : vector<16xf32>
    %240 = vector.multi_reduction <add>, %239, %cst_79 [1] : vector<16x8xf32> to vector<16xf32>
    %241 = vector.shape_cast %240 : vector<16xf32> to vector<16x1xf32>
    %242 = tpu.reciprocal %241 {approx = true} : vector<16x1xf32> -> vector<16x1xf32>
    %243 = vector.broadcast %242 : vector<16x1xf32> to vector<16x8xf32>
    %244 = arith.mulf %239, %243 : vector<16x8xf32>
    %c0_80 = arith.constant 0 : index
    %c0_81 = arith.constant 0 : index
    %245 = vector.load %arg9[%c0_80, %c0_81] : memref<16x8xf32, #tpu.memory_space<vmem>>, vector<16x8xf32>
    tpu.vector_store %arg9[%c0_80, %c0_81], %244 {strides = array<i32>} : memref<16x8xf32, #tpu.memory_space<vmem>>, vector<16x8xf32>,
    return
  }
  func.func @transform_0(%arg0: i32) -> (i32, i32, i32) {
    %c0_i32 = arith.constant 0 : i32
    %c0_i32_0 = arith.constant 0 : i32
    %c0_i32_1 = arith.constant 0 : i32
    return %c0_i32, %arg0, %c0_i32_0 : i32, i32, i32
  }
  func.func @transform_1(%arg0: i32) -> (i32, i32) {
    %c0_i32 = arith.constant 0 : i32
    %c0_i32_0 = arith.constant 0 : i32
    %c0_i32_1 = arith.constant 0 : i32
    return %c0_i32, %c0_i32_0 : i32, i32
  }
  func.func @transform_2(%arg0: i32) -> (i32, i32) {
    %c0_i32 = arith.constant 0 : i32
    %c0_i32_0 = arith.constant 0 : i32
    %c0_i32_1 = arith.constant 0 : i32
    return %c0_i32, %c0_i32_0 : i32, i32
  }
  func.func @transform_3(%arg0: i32) -> (i32, i32) {
    %c0_i32 = arith.constant 0 : i32
    %c0_i32_0 = arith.constant 0 : i32
    %c0_i32_1 = arith.constant 0 : i32
    return %c0_i32, %c0_i32_0 : i32, i32
  }
  func.func @transform_4(%arg0: i32) -> (i32, i32) {
    %c0_i32 = arith.constant 0 : i32
    %c0_i32_0 = arith.constant 0 : i32
    %c0_i32_1 = arith.constant 0 : i32
    return %c0_i32, %c0_i32_0 : i32, i32
  }
  func.func @transform_5(%arg0: i32) -> (i32, i32) {
    %c0_i32 = arith.constant 0 : i32
    %c0_i32_0 = arith.constant 0 : i32
    %c0_i32_1 = arith.constant 0 : i32
    return %c0_i32, %c0_i32_0 : i32, i32
  }
  func.func @transform_6(%arg0: i32) -> (i32, i32) {
    %c0_i32 = arith.constant 0 : i32
    %c0_i32_0 = arith.constant 0 : i32
    %c0_i32_1 = arith.constant 0 : i32
    return %c0_i32, %c0_i32_0 : i32, i32
  }
  func.func @transform_7(%arg0: i32) -> (i32, i32) {
    %c0_i32 = arith.constant 0 : i32
    %c0_i32_0 = arith.constant 0 : i32
    %c0_i32_1 = arith.constant 0 : i32
    return %c0_i32, %c0_i32_0 : i32, i32
  }
  func.func @transform_8(%arg0: i32) -> (i32, i32) {
    %c0_i32 = arith.constant 0 : i32
    %c0_i32_0 = arith.constant 0 : i32
    return %arg0, %c0_i32 : i32, i32
  }
}

</mosaic_0001>

<bundles_post_ra>
// kernel: tpu_custom_call.1
= control target key start
LH: loop header
LB: loop body
LE: loop exit
PB: predicated region body
PF: predicated region fallthrough
CT: control target
= control target key end

     0   :  { %13 = vsyncpa [#allocation4], 0  ;;  %s2395_s0 = inlined_call_operand.vmem [shape: bf16[8,16,48], index: 0, kind: input, shape index: {}]   ;;  %s2396_s1 = inlined_call_operand.hbm [shape: bf16[48,256], index: 1, kind: input, shape index: {}]   ;;  %s2397_s2 = inlined_call_operand.hbm [shape: bf16[64,256], index: 2, kind: input, shape index: {}]   ;;  %s2398_s3 = inlined_call_operand.vmem [shape: f32[1,256], index: 3, kind: input, shape index: {}]   ;;  %s2399_s4 = inlined_call_operand.hbm [shape: bf16[48,256], index: 4, kind: input, shape index: {}]   ;;  %s2400_s5 = inlined_call_operand.vmem [shape: f32[1,256], index: 5, kind: input, shape index: {}]   ;;  %s2401_s6 = inlined_call_operand.vmem [shape: bf16[128,8], index: 6, kind: input, shape index: {}]   ;;  %s2402_s7 = inlined_call_operand.vmem [shape: f32[1,8], index: 7, kind: input, shape index: {}]   ;;  %s2403_s8 = inlined_call_operand.vmem [shape: f32[16,8], index: 8, kind: output, shape index: {}]  }
   0x1   :  { %14 = vsyncpa [#allocation6], 0  ;;  %s1948_s27 = smov [#allocation5]   ;;  %s1949_s29 = smov [#allocation3]  }
   0x2   :  { %s34_s28 = sshll.u32 %s1948_s27, 4  ;;  %s22_s30 = sshll.u32 %s1949_s29, 4  ;;  %s35_s28 = int_to_ptr.vmem [resolvable:$true] %s34_s28  ;;  %s23_s30 = int_to_ptr.vmem [resolvable:$true] %s22_s30 }
   0x3   :  { %s1892_s9 = scalar_lea.vmem %s35_s28, 1024  ;;  %p1897_p1 = scmp.lt.s32.totalorder %s35_s28, %s35_s28 }
   0x4   :  { %p1893_p0 = scmp.ne.s32.totalorder %s35_s28, %s1892_s9  ;;  %p1898_p2 = scmp.lt.s32.totalorder %s1892_s9, %s1892_s9 }
   0x6   :  { %p1899_p3 = por %p1898_p2, %p1897_p1 }
   0x8   :  { %p1900_p4 = pnand %p1899_p3, %p1893_p0 }
   0xa   :  { %1903 = shalt.err (!%p1900_p4)
}
   0xb   :  { %s1950_s10 = smov 128   ;;  %s1951_s11 = smov 8  }
   0xc   :  { %40 = dma.hbm_to_vmem [thread:$0]  %s2397_s2, 1024, %s35_s28, [#allocation6], %s1950_s10, %s1950_s10, %s1951_s11  }
   0xd   :  { %s1912_s14 = scalar_lea.vmem %s23_s30, 768  ;;  %p1917_p6 = scmp.lt.s32.totalorder %s23_s30, %s23_s30 }
   0xe   :  { %p1913_p5 = scmp.ne.s32.totalorder %s23_s30, %s1912_s14  ;;  %p1918_p7 = scmp.lt.s32.totalorder %s1912_s14, %s1912_s14 }
  0x10   :  { %p1919_p8 = por %p1918_p7, %p1917_p6 }
  0x12   :  { %p1920_p9 = pnand %p1919_p8, %p1913_p5 }
  0x14   :  { %1923 = shalt.err (!%p1920_p9)
}
  0x15   :  { %28 = dma.hbm_to_vmem [thread:$0]  %s2396_s1, 768, %s23_s30, [#allocation4], %s1950_s10, %s1950_s10, %s1951_s11  }
  0x16   :  { %s1952_s17 = smov [#allocation7]  }
  0x17   :  { %s48_s18 = sshll.u32 %s1952_s17, 4  ;;  %s49_s18 = int_to_ptr.vmem [resolvable:$true] %s48_s18 }
  0x18   :  { %s1932_s19 = scalar_lea.vmem %s49_s18, 768  ;;  %p1937_p11 = scmp.lt.s32.totalorder %s49_s18, %s49_s18 }
  0x19   :  { %p1933_p10 = scmp.ne.s32.totalorder %s49_s18, %s1932_s19  ;;  %p1938_p12 = scmp.lt.s32.totalorder %s1932_s19, %s1932_s19 }
  0x1b   :  { %p1939_p13 = por %p1938_p12, %p1937_p11 }
  0x1d   :  { %p1940_p0 = pnand %p1939_p13, %p1933_p10 }
  0x1f   :  { %1943 = shalt.err (!%p1940_p0)
}
  0x20   :  { %54 = dma.hbm_to_vmem [thread:$0]  %s2399_s4, 768, %s49_s18, [#allocation6], %s1950_s10, %s1950_s10, %s1951_s11  }
  0x21   :  { %1944 = dma.done.wait [#allocation4], 768  }
  0x22   :  { %1945 = vsyncadd [#allocation4], 4294966528 }
  0x23   :  { %1946 = dma.done.wait [#allocation6], 1792  }
  0x24   :  { %1947 = vsyncadd [#allocation6], 4294965504  ;;  %v1953_v0 = vmov 0   ;;  %v1685_v1 = vld [vmem:[#allocation3 + $0x24] ss:$8 sps:$4 sm:$0xff]   ;;  %vm175_vm0 = vcmask 392192   ;;  %v95_v16 = vlaneseq }
  0x25   :  { %232 = vmatprep.mubr.bf16.mxu0 %v1953_v0  ;;  %433 = vmatprep.mubr.bf16.mxu1 %v1953_v0  ;;  %v2013_v2 = vld [vmem:[#allocation5 + $0x34] ss:$8 sps:$4 sm:$0xff]   ;;  %v1689_v3 = vld [vmem:[#allocation3 + $0x20] ss:$8 sps:$4 sm:$0xff]   ;;  %v1691_v5 = vld [vmem:[#allocation3 + $0x14] ss:$8 sps:$4 sm:$0xff]  }
  0x26   :  { %210 = vmatprep.subr.bf16.mxu0 %v1685_v1  ;;  %v2015_v4 = vld [vmem:[#allocation5 + $0x30] ss:$8 sps:$4 sm:$0xff]   ;;  %409 = vmatprep.subr.bf16.mxu1 %v2013_v2  ;;  %v2019_v6 = vld [vmem:[#allocation5 + $0x24] ss:$8 sps:$4 sm:$0xff]   ;;  %v1695_v7 = vld [vmem:[#allocation3 + $0x10] ss:$8 sps:$4 sm:$0xff]  }
  0x27   :  { %211 = vmatpush1.bf16.msra.mxu0 %v1689_v3  ;;  %410 = vmatpush1.bf16.msra.mxu1 %v2015_v4  ;;  %v2021_v8 = vld [vmem:[#allocation5 + $0x20] ss:$8 sps:$4 sm:$0xff]   ;;  %v1697_v9 = vld [vmem:[#allocation3 + $0x4] ss:$8 sps:$4 sm:$0xff]   ;;  %v1701_v11 = vld [vmem:[#allocation3] ss:$8 sps:$4 sm:$0xff]  }
  0x28   :  { %212 = vmatprep.subr.bf16.mxu0 %v1691_v5  ;;  %411 = vmatprep.subr.bf16.mxu1 %v2019_v6  ;;  %v2024_v10 = vld [vmem:[#allocation5 + $0x14] ss:$8 sps:$4 sm:$0xff]   ;;  %v2027_v12 = vld [vmem:[#allocation5 + $0x10] ss:$8 sps:$4 sm:$0xff]   ;;  %v2030_v13 = vld [vmem:[#allocation5 + $0x4] ss:$8 sps:$4 sm:$0xff]  }
  0x29   :  { %v1703_v14 = vld [vmem:[%s2395_s0] sm:$0xff]   ;;  %v2035_v15 = vld [vmem:[#allocation5] ss:$8 sps:$4 sm:$0xff]   ;;  %v2062_v17 = vshrl.u32 %v95_v16, 7  ;;  %v1707_v56 = vld [vmem:[%s2395_s0 + $0x8] sm:$0xff]   ;;  %vm397_vm1 = vcmask 523264  }
  0x2a   :  { %v93_v19 = vld [vmem:[%s2398_s3] sm:$0x3]  ;;  %s1954_s3 = smov 64   ;;  %vm1956_vm2 = vmmov 0   ;;  %vm1553_vm3 = vcmask 64512  }
  0x2b   :  { %213 = vmatpush1.bf16.msra.mxu0 %v1695_v7  ;;  %412 = vmatpush1.bf16.msra.mxu1 %v2021_v8  ;;  %v97_v18 = vsub.s32 0, %v2062_v17  ;;  %v101_v21 = vsub.s32 1, %v2062_v17 }
  0x2c   :  { %214 = vmatprep.subr.bf16.mxu0 %v1697_v9  ;;  %413 = vmatprep.subr.bf16.mxu1 %v2024_v10 }
  0x2d   :  { %v2070_v20 = vrot.slane %v93_v19, %v97_v18  ;;  %v2076_v24 = vrot.slane %v93_v19, %v101_v21 }
  0x2f   :  { %215 = vmatpush1.bf16.msra.mxu0 %v1701_v11  ;;  %414 = vmatpush1.bf16.msra.mxu1 %v2027_v12 }
  0x30   :  { %415 = vmatprep.subr.bf16.mxu1 %v2030_v13  ;;  %841 = vmatprep.subr.bf16.mxu0 %v2013_v2 }
  0x32   :  { %1598 = vmatmul.mubr.msk.bf16.vlgmr.msra.gmra.mxu0 %vm175_vm0, %v1703_v14 }
  0x33   :  { %416 = vmatpush1.bf16.msra.mxu1 %v2035_v15  ;;  %242 = vmatprep.mubr.bf16.mxu0 %v1953_v0 }
  0x34   :  { %517 = vmatprep.subr.bf16.mxu1 %v2013_v2  ;;  %842 = vmatpush1.bf16.msra.mxu0 %v2015_v4 }
  0x35   :  { %843 = vmatprep.subr.bf16.mxu0 %v2019_v6 }
  0x36   :  { %434 = vmatmul.mubr.bf16.vlgmr.msra.gmra.mxu1 %v1953_v0 }
  0x37   :  { %518 = vmatpush1.bf16.msra.mxu1 %v2015_v4  ;;  %541 = vmatprep.mubr.bf16.mxu1 %v1953_v0 }
  0x38   :  { %519 = vmatprep.subr.bf16.mxu1 %v2019_v6  ;;  %844 = vmatpush1.bf16.msra.mxu0 %v2021_v8 }
  0x39   :  { %845 = vmatprep.subr.bf16.mxu0 %v2024_v10 }
  0x3a   :  { %1599 = vmatmul.mubr.msk.bf16.gmra.mxu0 %vm175_vm0, %v1707_v56 }
  0x3b   :  { %520 = vmatpush1.bf16.msra.mxu1 %v2021_v8  ;;  %252 = vmatprep.mubr.bf16.mxu0 %v1953_v0 }
  0x3c   :  { %521 = vmatprep.subr.bf16.mxu1 %v2024_v10  ;;  %846 = vmatpush1.bf16.msra.mxu0 %v2027_v12 }
  0x3d   :  { %847 = vmatprep.subr.bf16.mxu0 %v2030_v13 }
  0x3f   :  { %522 = vmatpush1.bf16.msra.mxu1 %v2027_v12 }
  0x40   :  { %523 = vmatprep.subr.bf16.mxu1 %v2030_v13  ;;  %848 = vmatpush1.bf16.msra.mxu0 %v2035_v15 }
  0x41   :  { %1057 = vmatprep.subr.bf16.mxu0 %v2013_v2 }
  0x43   :  { %524 = vmatpush1.bf16.msra.mxu1 %v2035_v15 }
  0x44   :  { %625 = vmatprep.subr.bf16.mxu1 %v2013_v2 }
  0xf2   :  { %v234_v22 = vpop.f32.mrf.mxu0 }
  0xf3   :  { %v235_v23 = vadd.f32 %v234_v22, %v2070_v20 }
  0xf4   :  { %v236_v25 = vpop.f32.mrf.mxu0 }
  0xf5   :  { %v237_v28 = vadd.f32 %v236_v25, %v2076_v24 }
  0xf6   :  { %v238_v26 = vpop.f32.mrf.mxu0  ;;  %v435_v27 = vpop.f32.mrf.mxu1 }
  0xf7   :  { %v444_v29 = vadd.f32 %v435_v27, %v235_v23  ;;  %v239_v32 = vadd.f32 %v238_v26, %v2070_v20 }
  0xf8   :  { %v240_v30 = vpop.f32.mrf.mxu0  ;;  %v437_v31 = vpop.f32.mrf.mxu1 }
  0xf9   :  { %v445_v33 = vadd.f32 %v437_v31, %v237_v28  ;;  %v241_v35 = vadd.f32 %v240_v30, %v2076_v24  ;;  %v448_v41 = vmul.f32 0.5, %v444_v29 }
  0xfa   :  { %v439_v34 = vpop.f32.mrf.mxu1  ;;  %v244_v25 = vpop.f32.mrf.mxu0 }
  0xfb   :  { %v446_v36 = vadd.f32 %v439_v34, %v239_v32  ;;  %1732 = vtanh.f32 %v445_v33  ;;  %v449_v62 = vmul.f32 0.5, %v445_v33  ;;  %v245_v27 = vadd.f32 %v244_v25, %v2070_v20 }
  0xfc   :  { %v441_v37 = vpop.f32.mrf.mxu1  ;;  %v246_v26 = vpop.f32.mrf.mxu0 }
  0xfd   :  { %v447_v38 = vadd.f32 %v441_v37, %v241_v35  ;;  %v450_v42 = vmul.f32 0.5, %v446_v36  ;;  %v247_v30 = vadd.f32 %v246_v26, %v2076_v24 }
  0xfe   :  { %v248_v28 = vpop.f32.mrf.mxu0 }
  0xff   :  { %1734 = vtanh.f32 %v447_v38  ;;  %v451_v63 = vmul.f32 0.5, %v447_v38  ;;  %v249_v34 = vadd.f32 %v248_v28, %v2070_v20 }
 0x100   :  { %1736 = vtanh.f32 %v448_v41  ;;  %v250_v32 = vpop.f32.mrf.mxu0 }
 0x101   :  { %1738 = vtanh.f32 %v450_v42  ;;  %v251_v37 = vadd.f32 %v250_v32, %v2076_v24 }
 0x108   :  { %v1733_v39 = vpop.eup %1732 }
 0x109   :  { %470 = vrot.lane.b32.xlu0 %v1733_v39, %s1954_s3 }
 0x10c   :  { %v1735_v40 = vpop.eup %1734 }
 0x10d   :  { %472 = vrot.lane.b32.xlu0 %v1735_v40, %s1954_s3  ;;  %v1737_v43 = vpop.eup %1736 }
 0x10e   :  { %v456_v44 = vadd.f32 1.0, %v1737_v43  ;;  %v1739_v45 = vpop.eup %1738 }
 0x10f   :  { %v458_v47 = vadd.f32 1.0, %v1739_v45 }
 0x110   :  { %v460_v46 = vmul.f32 0.5, %v456_v44 }
 0x111   :  { %v462_v50 = vmul.f32 0.5, %v458_v47 }
 0x112   :  { %v466_v53 = vmul.f32 0.0, %v460_v46 }
 0x113   :  { %v467_v57 = vmul.f32 0.0, %v462_v50 }
 0x17b   :  { %v471_v48 = vpop.permute.xlu0 %470 }
 0x17c   :  { %v476_v49 = vmul.f32 %v471_v48, %v460_v46 }
 0x17e   :  { %480 = vrot.lane.b32.xlu1 %v476_v49, %s1954_s3 }
 0x17f   :  { %v473_v51 = vpop.permute.xlu0 %472 }
 0x180   :  { %v477_v52 = vmul.f32 %v473_v51, %v462_v50 }
 0x182   :  { %482 = vrot.lane.b32.xlu1 %v477_v52, %s1954_s3 }
 0x1f0   :  { %v481_v54 = vpop.permute.xlu1 %480 }
 0x1f1   :  { %v2085_v55 = vadd.f32 %v481_v54, %v466_v53 }
 0x1f3   :  { %1740 = vtanh.f32 %v2085_v55 }
 0x1f4   :  { %v483_v58 = vpop.permute.xlu1 %482 }
 0x1f5   :  { %v2092_v59 = vadd.f32 %v483_v58, %v467_v57 }
 0x1f7   :  { %1742 = vtanh.f32 %v2092_v59 }
 0x1f8   :  { %1744 = vtanh.f32 %v449_v62 }
 0x1f9   :  { %1746 = vtanh.f32 %v451_v63 }
 0x200   :  { %v1741_v60 = vpop.eup %1740 }
 0x201   :  { %492 = vrot.lane.b32.xlu0 %v1741_v60, %s1954_s3  ;;  %v1708_v60 = vld [vmem:[%s2395_s0 + $0x10] sm:$0xff]  }
 0x202   :  { %1600 = vmatmul.mubr.msk.bf16.gmra.mxu0 %vm175_vm0, %v1708_v60 }
 0x203   :  { %262 = vmatprep.mubr.bf16.mxu0 %v1953_v0 }
 0x204   :  { %v1743_v61 = vpop.eup %1742 }
 0x205   :  { %494 = vrot.lane.b32.xlu1 %v1743_v61, %s1954_s3  ;;  %v1745_v1 = vpop.eup %1744 }
 0x206   :  { %v1747_v3 = vpop.eup %1746  ;;  %v457_v5 = vadd.f32 1.0, %v1745_v1 }
 0x207   :  { %v459_v7 = vadd.f32 1.0, %v1747_v3 }
 0x208   :  { %v461_v11 = vmul.f32 0.5, %v457_v5 }
 0x209   :  { %v463_v14 = vmul.f32 0.5, %v459_v7 }
 0x273   :  { %v493_v9 = vpop.permute.xlu0 %492 }
 0x274   :  { %v498_v19 = vmul.f32 %v493_v9, %v461_v11 }
 0x277   :  { %v495_v16 = vpop.permute.xlu1 %494 }
 0x278   :  { %v499_v22 = vmul.f32 %v495_v16, %v463_v14 }
 0x27a   :  { %v500_v23 = vpack.c.bf16 %v499_v22, %v498_v19 }
 0x27c   :  { %1614 = vmatmul.mubr.msk.bf16.vlgmr.msra.gmra.mxu1 %vm397_vm1, %v500_v23 }
 0x27d   :  { %626 = vmatpush1.bf16.msra.mxu1 %v2015_v4  ;;  %649 = vmatprep.mubr.bf16.mxu1 %v1953_v0 }
 0x27e   :  { %627 = vmatprep.subr.bf16.mxu1 %v2019_v6 }
 0x281   :  { %628 = vmatpush1.bf16.msra.mxu1 %v2021_v8 }
 0x282   :  { %629 = vmatprep.subr.bf16.mxu1 %v2024_v10 }
 0x285   :  { %630 = vmatpush1.bf16.msra.mxu1 %v2027_v12 }
 0x286   :  { %631 = vmatprep.subr.bf16.mxu1 %v2030_v13 }
 0x289   :  { %632 = vmatpush1.bf16.msra.mxu1 %v2035_v15 }
 0x28a   :  { %733 = vmatprep.subr.bf16.mxu1 %v2013_v2 }
 0x33c   :  { %v543_v29 = vpop.f32.mrf.mxu1 }
 0x33d   :  { %v552_v31 = vadd.f32 %v543_v29, %v245_v27  ;;  %v254_v27 = vpop.f32.mrf.mxu0 }
 0x33e   :  { %v545_v33 = vpop.f32.mrf.mxu1  ;;  %v255_v29 = vadd.f32 %v254_v27, %v2070_v20 }
 0x33f   :  { %v553_v35 = vadd.f32 %v545_v33, %v247_v30  ;;  %v556_v43 = vmul.f32 0.5, %v552_v31  ;;  %v256_v28 = vpop.f32.mrf.mxu0 }
 0x340   :  { %v547_v36 = vpop.f32.mrf.mxu1  ;;  %v257_v32 = vadd.f32 %v256_v28, %v2076_v24 }
 0x341   :  { %v554_v38 = vadd.f32 %v547_v36, %v249_v34  ;;  %1748 = vtanh.f32 %v553_v35  ;;  %v557_v3 = vmul.f32 0.5, %v553_v35  ;;  %v258_v30 = vpop.f32.mrf.mxu0 }
 0x342   :  { %v549_v39 = vpop.f32.mrf.mxu1  ;;  %v259_v36 = vadd.f32 %v258_v30, %v2070_v20 }
 0x343   :  { %v555_v40 = vadd.f32 %v549_v39, %v251_v37  ;;  %v558_v44 = vmul.f32 0.5, %v554_v38  ;;  %v260_v34 = vpop.f32.mrf.mxu0 }
 0x344   :  { %v261_v39 = vadd.f32 %v260_v34, %v2076_v24 }
 0x345   :  { %1750 = vtanh.f32 %v555_v40  ;;  %v559_v5 = vmul.f32 0.5, %v555_v40 }
 0x346   :  { %1752 = vtanh.f32 %v556_v43 }
 0x347   :  { %1754 = vtanh.f32 %v558_v44 }
 0x34e   :  { %v1749_v41 = vpop.eup %1748 }
 0x34f   :  { %578 = vrot.lane.b32.xlu0 %v1749_v41, %s1954_s3 }
 0x352   :  { %v1751_v42 = vpop.eup %1750 }
 0x353   :  { %580 = vrot.lane.b32.xlu1 %v1751_v42, %s1954_s3  ;;  %v1753_v45 = vpop.eup %1752 }
 0x354   :  { %v564_v46 = vadd.f32 1.0, %v1753_v45  ;;  %v1755_v47 = vpop.eup %1754 }
 0x355   :  { %v566_v49 = vadd.f32 1.0, %v1755_v47 }
 0x356   :  { %v568_v48 = vmul.f32 0.5, %v564_v46 }
 0x357   :  { %v570_v52 = vmul.f32 0.5, %v566_v49 }
 0x358   :  { %v574_v56 = vmul.f32 %v568_v48, %v2085_v55 }
 0x359   :  { %v575_v61 = vmul.f32 %v570_v52, %v2092_v59 }
 0x3c1   :  { %v579_v50 = vpop.permute.xlu0 %578 }
 0x3c2   :  { %v584_v51 = vmul.f32 %v579_v50, %v568_v48 }
 0x3c4   :  { %588 = vrot.lane.b32.xlu0 %v584_v51, %s1954_s3 }
 0x3c5   :  { %v581_v53 = vpop.permute.xlu1 %580 }
 0x3c6   :  { %v585_v54 = vmul.f32 %v581_v53, %v570_v52 }
 0x3c8   :  { %590 = vrot.lane.b32.xlu1 %v585_v54, %s1954_s3 }
 0x436   :  { %v589_v57 = vpop.permute.xlu0 %588 }
 0x437   :  { %v2117_v58 = vadd.f32 %v589_v57, %v574_v56 }
 0x439   :  { %1756 = vtanh.f32 %v2117_v58 }
 0x43a   :  { %v591_v62 = vpop.permute.xlu1 %590 }
 0x43b   :  { %v2125_v63 = vadd.f32 %v591_v62, %v575_v61 }
 0x43d   :  { %1758 = vtanh.f32 %v2125_v63 }
 0x43e   :  { %1760 = vtanh.f32 %v557_v3 }
 0x43f   :  { %1762 = vtanh.f32 %v559_v5 }
 0x446   :  { %v1757_v55 = vpop.eup %1756 }
 0x447   :  { %600 = vrot.lane.b32.xlu0 %v1757_v55, %s1954_s3  ;;  %v1709_v55 = vld [vmem:[%s2395_s0 + $0x18] sm:$0xff]  }
 0x448   :  { %1601 = vmatmul.mubr.msk.bf16.gmra.mxu0 %vm175_vm0, %v1709_v55  ;;  %v1711_v55 = vld [vmem:[%s2395_s0 + $0x28] sm:$0xff]  }
 0x449   :  { %272 = vmatprep.mubr.bf16.mxu0 %v1953_v0 }
 0x44a   :  { %v1759_v1 = vpop.eup %1758 }
 0x44b   :  { %602 = vrot.lane.b32.xlu1 %v1759_v1, %s1954_s3  ;;  %v1761_v59 = vpop.eup %1760 }
 0x44c   :  { %v1763_v7 = vpop.eup %1762  ;;  %v565_v9 = vadd.f32 1.0, %v1761_v59 }
 0x44d   :  { %v567_v11 = vadd.f32 1.0, %v1763_v7 }
 0x44e   :  { %v569_v16 = vmul.f32 0.5, %v565_v9 }
 0x44f   :  { %v571_v19 = vmul.f32 0.5, %v567_v11 }
 0x4b9   :  { %v601_v14 = vpop.permute.xlu0 %600 }
 0x4ba   :  { %v606_v23 = vmul.f32 %v601_v14, %v569_v16 }
 0x4bd   :  { %v603_v22 = vpop.permute.xlu1 %602 }
 0x4be   :  { %v607_v25 = vmul.f32 %v603_v22, %v571_v19 }
 0x4c0   :  { %v608_v26 = vpack.c.bf16 %v607_v25, %v606_v23 }
 0x4c2   :  { %1615 = vmatmul.mubr.msk.bf16.vlgmr.msra.gmra.mxu1 %vm397_vm1, %v608_v26 }
 0x4c3   :  { %734 = vmatpush1.bf16.msra.mxu1 %v2015_v4  ;;  %757 = vmatprep.mubr.bf16.mxu1 %v1953_v0 }
 0x4c4   :  { %735 = vmatprep.subr.bf16.mxu1 %v2019_v6 }
 0x4c7   :  { %736 = vmatpush1.bf16.msra.mxu1 %v2021_v8 }
 0x4c8   :  { %737 = vmatprep.subr.bf16.mxu1 %v2024_v10 }
 0x4cb   :  { %738 = vmatpush1.bf16.msra.mxu1 %v2027_v12 }
 0x4cc   :  { %739 = vmatprep.subr.bf16.mxu1 %v2030_v13 }
 0x4cf   :  { %740 = vmatpush1.bf16.msra.mxu1 %v2035_v15 }
 0x4d0   :  { %949 = vmatprep.subr.bf16.mxu1 %v2013_v2 }
 0x582   :  { %v651_v31 = vpop.f32.mrf.mxu1 }
 0x583   :  { %v660_v33 = vadd.f32 %v651_v31, %v255_v29  ;;  %v264_v29 = vpop.f32.mrf.mxu0 }
 0x584   :  { %v653_v35 = vpop.f32.mrf.mxu1  ;;  %v265_v31 = vadd.f32 %v264_v29, %v2070_v20 }
 0x585   :  { %v661_v37 = vadd.f32 %v653_v35, %v257_v32  ;;  %v664_v45 = vmul.f32 0.5, %v660_v33  ;;  %v266_v30 = vpop.f32.mrf.mxu0 }
 0x586   :  { %v655_v38 = vpop.f32.mrf.mxu1  ;;  %v267_v34 = vadd.f32 %v266_v30, %v2076_v24 }
 0x587   :  { %v662_v40 = vadd.f32 %v655_v38, %v259_v36  ;;  %1764 = vtanh.f32 %v661_v37  ;;  %v665_v7 = vmul.f32 0.5, %v661_v37  ;;  %v268_v32 = vpop.f32.mrf.mxu0 }
 0x588   :  { %v657_v41 = vpop.f32.mrf.mxu1  ;;  %v269_v38 = vadd.f32 %v268_v32, %v2070_v20 }
 0x589   :  { %v663_v42 = vadd.f32 %v657_v41, %v261_v39  ;;  %v666_v46 = vmul.f32 0.5, %v662_v40  ;;  %v270_v36 = vpop.f32.mrf.mxu0 }
 0x58a   :  { %v271_v41 = vadd.f32 %v270_v36, %v2076_v24 }
 0x58b   :  { %1766 = vtanh.f32 %v663_v42  ;;  %v667_v9 = vmul.f32 0.5, %v663_v42 }
 0x58c   :  { %1768 = vtanh.f32 %v664_v45 }
 0x58d   :  { %1770 = vtanh.f32 %v666_v46 }
 0x594   :  { %v1765_v43 = vpop.eup %1764 }
 0x595   :  { %686 = vrot.lane.b32.xlu0 %v1765_v43, %s1954_s3 }
 0x598   :  { %v1767_v44 = vpop.eup %1766 }
 0x599   :  { %688 = vrot.lane.b32.xlu1 %v1767_v44, %s1954_s3  ;;  %v1769_v47 = vpop.eup %1768 }
 0x59a   :  { %v672_v48 = vadd.f32 1.0, %v1769_v47  ;;  %v1771_v49 = vpop.eup %1770 }
 0x59b   :  { %v674_v51 = vadd.f32 1.0, %v1771_v49 }
 0x59c   :  { %v676_v50 = vmul.f32 0.5, %v672_v48 }
 0x59d   :  { %v678_v54 = vmul.f32 0.5, %v674_v51 }
 0x59e   :  { %v682_v60 = vmul.f32 %v676_v50, %v2117_v58 }
 0x59f   :  { %v683_v1 = vmul.f32 %v678_v54, %v2125_v63 }
 0x607   :  { %v687_v52 = vpop.permute.xlu0 %686 }
 0x608   :  { %v692_v53 = vmul.f32 %v687_v52, %v676_v50 }
 0x60a   :  { %696 = vrot.lane.b32.xlu0 %v692_v53, %s1954_s3 }
 0x60b   :  { %v689_v56 = vpop.permute.xlu1 %688 }
 0x60c   :  { %v693_v57 = vmul.f32 %v689_v56, %v678_v54 }
 0x60e   :  { %698 = vrot.lane.b32.xlu1 %v693_v57, %s1954_s3 }
 0x67c   :  { %v697_v61 = vpop.permute.xlu0 %696 }
 0x67d   :  { %v2150_v62 = vadd.f32 %v697_v61, %v682_v60  ;;  %v1710_v61 = vld [vmem:[%s2395_s0 + $0x20] sm:$0xff]  }
 0x67e   :  { %1602 = vmatmul.mubr.msk.bf16.gmra.mxu0 %vm175_vm0, %v1710_v61 }
 0x67f   :  { %1772 = vtanh.f32 %v2150_v62  ;;  %282 = vmatprep.mubr.bf16.mxu0 %v1953_v0 }
 0x680   :  { %v699_v3 = vpop.permute.xlu1 %698 }
 0x681   :  { %v2158_v5 = vadd.f32 %v699_v3, %v683_v1  ;;  %v1712_v1 = vld [vmem:[%s2395_s0 + $0x30] sm:$0xff]   ;;  %v1713_v3 = vld [vmem:[%s2395_s0 + $0x38] sm:$0xff]  }
 0x683   :  { %1774 = vtanh.f32 %v2158_v5 }
 0x684   :  { %1776 = vtanh.f32 %v665_v7 }
 0x685   :  { %1778 = vtanh.f32 %v667_v9 }
 0x686   :  { %1603 = vmatmul.mubr.msk.bf16.gmra.mxu0 %vm175_vm0, %v1711_v55 }
 0x687   :  { %292 = vmatprep.mubr.bf16.mxu0 %v1953_v0 }
 0x68c   :  { %v1773_v58 = vpop.eup %1772 }
 0x68d   :  { %708 = vrot.lane.b32.xlu0 %v1773_v58, %s1954_s3 }
 0x68e   :  { %1604 = vmatmul.mubr.msk.bf16.gmra.mxu0 %vm175_vm0, %v1712_v1 }
 0x68f   :  { %302 = vmatprep.mubr.bf16.mxu0 %v1953_v0 }
 0x690   :  { %v1775_v59 = vpop.eup %1774 }
 0x691   :  { %710 = vrot.lane.b32.xlu1 %v1775_v59, %s1954_s3  ;;  %v1777_v63 = vpop.eup %1776 }
 0x692   :  { %v1779_v11 = vpop.eup %1778  ;;  %v673_v14 = vadd.f32 1.0, %v1777_v63 }
 0x693   :  { %v675_v16 = vadd.f32 1.0, %v1779_v11 }
 0x694   :  { %v677_v22 = vmul.f32 0.5, %v673_v14 }
 0x695   :  { %v679_v23 = vmul.f32 0.5, %v675_v16 }
 0x696   :  { %1605 = vmatmul.mubr.msk.bf16.gmra.mxu0 %vm175_vm0, %v1713_v3 }
 0x697   :  { %865 = vmatprep.mubr.bf16.mxu0 %v1953_v0 }
 0x6ff   :  { %v709_v19 = vpop.permute.xlu0 %708 }
 0x700   :  { %v714_v26 = vmul.f32 %v709_v19, %v677_v22 }
 0x703   :  { %v711_v25 = vpop.permute.xlu1 %710 }
 0x704   :  { %v715_v27 = vmul.f32 %v711_v25, %v679_v23 }
 0x706   :  { %v716_v28 = vpack.c.bf16 %v715_v27, %v714_v26 }
 0x708   :  { %1616 = vmatmul.mubr.msk.bf16.vlgmr.msra.gmra.mxu1 %vm397_vm1, %v716_v28 }
 0x709   :  { %950 = vmatpush1.bf16.msra.mxu1 %v2015_v4  ;;  %973 = vmatprep.mubr.bf16.mxu1 %v1953_v0 }
 0x70a   :  { %951 = vmatprep.subr.bf16.mxu1 %v2019_v6 }
 0x70d   :  { %952 = vmatpush1.bf16.msra.mxu1 %v2021_v8 }
 0x70e   :  { %953 = vmatprep.subr.bf16.mxu1 %v2024_v10 }
 0x711   :  { %954 = vmatpush1.bf16.msra.mxu1 %v2027_v12 }
 0x712   :  { %955 = vmatprep.subr.bf16.mxu1 %v2030_v13 }
 0x715   :  { %956 = vmatpush1.bf16.msra.mxu1 %v2035_v15 }
 0x716   :  { %1165 = vmatprep.subr.bf16.mxu1 %v2013_v2 }
 0x7c8   :  { %v759_v33 = vpop.f32.mrf.mxu1 }
 0x7c9   :  { %v768_v35 = vadd.f32 %v759_v33, %v265_v31  ;;  %v274_v33 = vpop.f32.mrf.mxu0 }
 0x7ca   :  { %v761_v37 = vpop.f32.mrf.mxu1 }
 0x7cb   :  { %v769_v39 = vadd.f32 %v761_v37, %v267_v34  ;;  %v772_v46 = vmul.f32 0.5, %v768_v35  ;;  %v276_v34 = vpop.f32.mrf.mxu0 }
 0x7cc   :  { %v763_v40 = vpop.f32.mrf.mxu1 }
 0x7cd   :  { %v770_v42 = vadd.f32 %v763_v40, %v269_v38  ;;  %1780 = vtanh.f32 %v769_v39  ;;  %v773_v19 = vmul.f32 0.5, %v769_v39  ;;  %v278_v35 = vpop.f32.mrf.mxu0 }
 0x7ce   :  { %v765_v2 = vpop.f32.mrf.mxu1 }
 0x7cf   :  { %v771_v43 = vadd.f32 %v765_v2, %v271_v41  ;;  %v774_v47 = vmul.f32 0.5, %v770_v42  ;;  %v280_v36 = vpop.f32.mrf.mxu0 }
 0x7d1   :  { %1782 = vtanh.f32 %v771_v43  ;;  %v2221_v37 = vpop.f32.mrf.mxu0 }
 0x7d2   :  { %1784 = vtanh.f32 %v772_v46 }
 0x7d3   :  { %1786 = vtanh.f32 %v774_v47  ;;  %v2223_v38 = vpop.f32.mrf.mxu0 }
 0x7d5   :  { %v2225_v39 = vpop.f32.mrf.mxu0 }
 0x7d7   :  { %v2227_v40 = vpop.f32.mrf.mxu0 }
 0x7d9   :  { %v2229_v41 = vpop.f32.mrf.mxu0 }
 0x7da   :  { %v1781_v44 = vpop.eup %1780 }
 0x7db   :  { %794 = vrot.lane.b32.xlu0 %v1781_v44, %s1954_s3  ;;  %v2231_v42 = vpop.f32.mrf.mxu0 }
 0x7dd   :  { %v2233_v2 = vpop.f32.mrf.mxu0 }
 0x7de   :  { %v1783_v45 = vpop.eup %1782 }
 0x7df   :  { %796 = vrot.lane.b32.xlu1 %v1783_v45, %s1954_s3  ;;  %v1785_v48 = vpop.eup %1784 }
 0x7e0   :  { %v780_v49 = vadd.f32 1.0, %v1785_v48  ;;  %v1787_v50 = vpop.eup %1786  ;;  %v275_v48 = vadd.f32 %v274_v33, %v2070_v20 }
 0x7e1   :  { %v782_v52 = vadd.f32 1.0, %v1787_v50  ;;  %v277_v50 = vadd.f32 %v276_v34, %v2076_v24 }
 0x7e2   :  { %v784_v51 = vmul.f32 0.5, %v780_v49 }
 0x7e3   :  { %v786_v56 = vmul.f32 0.5, %v782_v52 }
 0x7e4   :  { %v790_v58 = vmul.f32 %v784_v51, %v2150_v62  ;;  %v775_v62 = vmul.f32 0.5, %v771_v43  ;;  %v2235_v43 = vpop.f32.mrf.mxu0 }
 0x7e5   :  { %v791_v9 = vmul.f32 %v786_v56, %v2158_v5 }
 0x7e6   :  { %v2237_v44 = vpop.f32.mrf.mxu0 }
 0x7e8   :  { %v2239_v45 = vpop.f32.mrf.mxu0 }
 0x7ea   :  { %v2241_v46 = vpop.f32.mrf.mxu0 }
 0x7ec   :  { %v2243_v47 = vpop.f32.mrf.mxu0 }
 0x84d   :  { %v795_v53 = vpop.permute.xlu0 %794 }
 0x84e   :  { %v800_v54 = vmul.f32 %v795_v53, %v784_v51  ;;  %v279_v53 = vadd.f32 %v278_v35, %v2070_v20 }
 0x850   :  { %804 = vrot.lane.b32.xlu0 %v800_v54, %s1954_s3 }
 0x851   :  { %v797_v57 = vpop.permute.xlu1 %796 }
 0x852   :  { %v801_v60 = vmul.f32 %v797_v57, %v786_v56  ;;  %v281_v57 = vadd.f32 %v280_v36, %v2076_v24 }
 0x854   :  { %806 = vrot.lane.b32.xlu1 %v801_v60, %s1954_s3 }
 0x8c2   :  { %v805_v59 = vpop.permute.xlu0 %804 }
 0x8c3   :  { %v2203_v7 = vadd.f32 %v805_v59, %v790_v58 }
 0x8c5   :  { %1788 = vtanh.f32 %v2203_v7 }
 0x8c6   :  { %v807_v63 = vpop.permute.xlu1 %806 }
 0x8c7   :  { %v2207_v11 = vadd.f32 %v807_v63, %v791_v9 }
 0x8c9   :  { %1790 = vtanh.f32 %v2207_v11 }
 0x8ca   :  { %1792 = vtanh.f32 %v773_v19 }
 0x8cb   :  { %1794 = vtanh.f32 %v775_v62 }
 0x8d2   :  { %v1789_v14 = vpop.eup %1788 }
 0x8d3   :  { %816 = vrot.lane.b32.xlu0 %v1789_v14, %s1954_s3 }
 0x8d6   :  { %v1791_v16 = vpop.eup %1790 }
 0x8d7   :  { %818 = vrot.lane.b32.xlu1 %v1791_v16, %s1954_s3  ;;  %v1793_v22 = vpop.eup %1792 }
 0x8d8   :  { %v1795_v23 = vpop.eup %1794  ;;  %v781_v25 = vadd.f32 1.0, %v1793_v22 }
 0x8d9   :  { %v783_v26 = vadd.f32 1.0, %v1795_v23 }
 0x8da   :  { %v785_v27 = vmul.f32 0.5, %v781_v25 }
 0x8db   :  { %v787_v28 = vmul.f32 0.5, %v783_v26 }
 0x945   :  { %v817_v5 = vpop.permute.xlu0 %816 }
 0x946   :  { %v822_v30 = vmul.f32 %v817_v5, %v785_v27 }
 0x949   :  { %v819_v29 = vpop.permute.xlu1 %818 }
 0x94a   :  { %v823_v31 = vmul.f32 %v819_v29, %v787_v28 }
 0x94c   :  { %v824_v32 = vpack.c.bf16 %v823_v31, %v822_v30 }
 0x94e   :  { %1617 = vmatmul.mubr.msk.bf16.vlgmr.msra.gmra.mxu0 %vm397_vm1, %v824_v32 }
 0x94f   :  { %1058 = vmatpush1.bf16.msra.mxu0 %v2015_v4  ;;  %1081 = vmatprep.mubr.bf16.mxu0 %v1953_v0 }
 0x950   :  { %1059 = vmatprep.subr.bf16.mxu0 %v2019_v6 }
 0x953   :  { %1060 = vmatpush1.bf16.msra.mxu0 %v2021_v8 }
 0x954   :  { %1061 = vmatprep.subr.bf16.mxu0 %v2024_v10 }
 0x957   :  { %1062 = vmatpush1.bf16.msra.mxu0 %v2027_v12 }
 0x958   :  { %1063 = vmatprep.subr.bf16.mxu0 %v2030_v13 }
 0x95b   :  { %1064 = vmatpush1.bf16.msra.mxu0 %v2035_v15 }
 0xa0e   :  { %v867_v49 = vpop.f32.mrf.mxu0 }
 0xa0f   :  { %v876_v51 = vadd.f32 %v867_v49, %v275_v48 }
 0xa10   :  { %v869_v52 = vpop.f32.mrf.mxu0 }
 0xa11   :  { %v877_v54 = vadd.f32 %v869_v52, %v277_v50  ;;  %v880_v58 = vmul.f32 0.5, %v876_v51 }
 0xa12   :  { %v871_v56 = vpop.f32.mrf.mxu0 }
 0xa13   :  { %v878_v60 = vadd.f32 %v871_v56, %v279_v53  ;;  %1796 = vtanh.f32 %v877_v54  ;;  %v881_v34 = vmul.f32 0.5, %v877_v54  ;;  %v285_v54 = vadd.f32 %v2221_v37, %v2070_v20 }
 0xa14   :  { %v873_v61 = vpop.f32.mrf.mxu0 }
 0xa15   :  { %v879_v55 = vadd.f32 %v873_v61, %v281_v57  ;;  %v882_v59 = vmul.f32 0.5, %v878_v60 }
 0xa17   :  { %1798 = vtanh.f32 %v879_v55 }
 0xa18   :  { %1800 = vtanh.f32 %v880_v58 }
 0xa19   :  { %1802 = vtanh.f32 %v882_v59 }
 0xa20   :  { %v1797_v1 = vpop.eup %1796 }
 0xa21   :  { %902 = vrot.lane.b32.xlu0 %v1797_v1, %s1954_s3 }
 0xa24   :  { %v1799_v3 = vpop.eup %1798 }
 0xa25   :  { %904 = vrot.lane.b32.xlu1 %v1799_v3, %s1954_s3  ;;  %v1801_v9 = vpop.eup %1800 }
 0xa26   :  { %v888_v63 = vadd.f32 1.0, %v1801_v9  ;;  %v1803_v14 = vpop.eup %1802 }
 0xa27   :  { %v890_v19 = vadd.f32 1.0, %v1803_v14 }
 0xa28   :  { %v892_v16 = vmul.f32 0.5, %v888_v63 }
 0xa29   :  { %v894_v23 = vmul.f32 0.5, %v890_v19 }
 0xa2a   :  { %v898_v5 = vmul.f32 %v892_v16, %v2203_v7  ;;  %v883_v7 = vmul.f32 0.5, %v879_v55 }
 0xa2b   :  { %v899_v29 = vmul.f32 %v894_v23, %v2207_v11 }
 0xa93   :  { %v903_v62 = vpop.permute.xlu0 %902 }
 0xa94   :  { %v908_v22 = vmul.f32 %v903_v62, %v892_v16 }
 0xa96   :  { %912 = vrot.lane.b32.xlu0 %v908_v22, %s1954_s3 }
 0xa97   :  { %v905_v25 = vpop.permute.xlu1 %904 }
 0xa98   :  { %v909_v26 = vmul.f32 %v905_v25, %v894_v23 }
 0xa9a   :  { %914 = vrot.lane.b32.xlu1 %v909_v26, %s1954_s3 }
 0xb08   :  { %v913_v27 = vpop.permute.xlu0 %912 }
 0xb09   :  { %v2254_v28 = vadd.f32 %v913_v27, %v898_v5 }
 0xb0b   :  { %1804 = vtanh.f32 %v2254_v28 }
 0xb0c   :  { %v915_v30 = vpop.permute.xlu1 %914 }
 0xb0d   :  { %v2258_v31 = vadd.f32 %v915_v30, %v899_v29 }
 0xb0f   :  { %1806 = vtanh.f32 %v2258_v31 }
 0xb10   :  { %1808 = vtanh.f32 %v881_v34 }
 0xb11   :  { %1810 = vtanh.f32 %v883_v7 }
 0xb18   :  { %v1805_v32 = vpop.eup %1804 }
 0xb19   :  { %924 = vrot.lane.b32.xlu0 %v1805_v32, %s1954_s3 }
 0xb1c   :  { %v1807_v33 = vpop.eup %1806 }
 0xb1d   :  { %926 = vrot.lane.b32.xlu1 %v1807_v33, %s1954_s3  ;;  %v1809_v35 = vpop.eup %1808 }
 0xb1e   :  { %v1811_v36 = vpop.eup %1810  ;;  %v889_v48 = vadd.f32 1.0, %v1809_v35 }
 0xb1f   :  { %v891_v49 = vadd.f32 1.0, %v1811_v36 }
 0xb20   :  { %v893_v50 = vmul.f32 0.5, %v889_v48 }
 0xb21   :  { %v895_v51 = vmul.f32 0.5, %v891_v49 }
 0xb8b   :  { %v925_v11 = vpop.permute.xlu0 %924 }
 0xb8c   :  { %v930_v53 = vmul.f32 %v925_v11, %v893_v50 }
 0xb8f   :  { %v927_v52 = vpop.permute.xlu1 %926 }
 0xb90   :  { %v931_v56 = vmul.f32 %v927_v52, %v895_v51 }
 0xb92   :  { %v932_v57 = vpack.c.bf16 %v931_v56, %v930_v53  ;;  %v295_v53 = vadd.f32 %v2229_v41, %v2070_v20 }
 0xb94   :  { %1618 = vmatmul.mubr.msk.bf16.vlgmr.msra.gmra.mxu1 %vm397_vm1, %v932_v57  ;;  %v297_v57 = vadd.f32 %v2231_v42, %v2076_v24 }
 0xb95   :  { %1166 = vmatpush1.bf16.msra.mxu1 %v2015_v4  ;;  %1189 = vmatprep.mubr.bf16.mxu1 %v1953_v0  ;;  %v287_v4 = vadd.f32 %v2223_v38, %v2076_v24 }
 0xb96   :  { %1167 = vmatprep.subr.bf16.mxu1 %v2019_v6  ;;  %v289_v6 = vadd.f32 %v2225_v39, %v2070_v20 }
 0xb99   :  { %1168 = vmatpush1.bf16.msra.mxu1 %v2021_v8 }
 0xb9a   :  { %1169 = vmatprep.subr.bf16.mxu1 %v2024_v10 }
 0xb9d   :  { %1170 = vmatpush1.bf16.msra.mxu1 %v2027_v12  ;;  %v291_v12 = vadd.f32 %v2227_v40, %v2076_v24 }
 0xb9e   :  { %1171 = vmatprep.subr.bf16.mxu1 %v2030_v13 }
 0xba1   :  { %1172 = vmatpush1.bf16.msra.mxu1 %v2035_v15 }
 0xc54   :  { %v975_v60 = vpop.f32.mrf.mxu1 }
 0xc55   :  { %v984_v61 = vadd.f32 %v975_v60, %v285_v54 }
 0xc56   :  { %v977_v55 = vpop.f32.mrf.mxu1 }
 0xc57   :  { %v985_v8 = vadd.f32 %v977_v55, %v287_v4  ;;  %v988_v38 = vmul.f32 0.5, %v984_v61  ;;  %v299_v4 = vadd.f32 %v2233_v2, %v2070_v20 }
 0xc58   :  { %v979_v10 = vpop.f32.mrf.mxu1 }
 0xc59   :  { %v986_v13 = vadd.f32 %v979_v10, %v289_v6  ;;  %1812 = vtanh.f32 %v985_v8  ;;  %v989_v33 = vmul.f32 0.5, %v985_v8  ;;  %v301_v6 = vadd.f32 %v2235_v43, %v2076_v24 }
 0xc5a   :  { %v981_v15 = vpop.f32.mrf.mxu1 }
 0xc5b   :  { %v987_v1 = vadd.f32 %v981_v15, %v291_v12  ;;  %v990_v58 = vmul.f32 0.5, %v986_v13 }
 0xc5d   :  { %1814 = vtanh.f32 %v987_v1  ;;  %v991_v34 = vmul.f32 0.5, %v987_v1 }
 0xc5e   :  { %1816 = vtanh.f32 %v988_v38 }
 0xc5f   :  { %1818 = vtanh.f32 %v990_v58 }
 0xc66   :  { %v1813_v37 = vpop.eup %1812 }
 0xc67   :  { %1010 = vrot.lane.b32.xlu0 %v1813_v37, %s1954_s3 }
 0xc6a   :  { %v1815_v3 = vpop.eup %1814 }
 0xc6b   :  { %1012 = vrot.lane.b32.xlu1 %v1815_v3, %s1954_s3  ;;  %v1817_v39 = vpop.eup %1816 }
 0xc6c   :  { %v996_v59 = vadd.f32 1.0, %v1817_v39  ;;  %v1819_v9 = vpop.eup %1818 }
 0xc6d   :  { %v998_v40 = vadd.f32 1.0, %v1819_v9 }
 0xc6e   :  { %v1000_v63 = vmul.f32 0.5, %v996_v59 }
 0xc6f   :  { %v1002_v19 = vmul.f32 0.5, %v998_v40 }
 0xc70   :  { %v1006_v23 = vmul.f32 %v1000_v63, %v2254_v28 }
 0xc71   :  { %v1007_v5 = vmul.f32 %v1002_v19, %v2258_v31 }
 0xcd9   :  { %v1011_v14 = vpop.permute.xlu0 %1010 }
 0xcda   :  { %v1016_v16 = vmul.f32 %v1011_v14, %v1000_v63 }
 0xcdc   :  { %1020 = vrot.lane.b32.xlu0 %v1016_v16, %s1954_s3 }
 0xcdd   :  { %v1013_v62 = vpop.permute.xlu1 %1012 }
 0xcde   :  { %v1017_v22 = vmul.f32 %v1013_v62, %v1002_v19  ;;  %v1714_v62 = vld [vmem:[#allocation7 + $0x20] ss:$8 sps:$4 sm:$0xff]  }
 0xce0   :  { %1022 = vrot.lane.b32.xlu1 %v1017_v22, %s1954_s3  ;;  %v1716_v22 = vld [vmem:[#allocation7 + $0x24] ss:$8 sps:$4 sm:$0xff]  }
 0xce1   :  { %1326 = vmatprep.subr.bf16.mxu0 %v1716_v22 }
 0xd4e   :  { %v1021_v25 = vpop.permute.xlu0 %1020 }
 0xd4f   :  { %v1026_v26 = vadd.f32 %v1021_v25, %v1006_v23  ;;  %v1719_v23 = vld [vmem:[#allocation7 + $0x14] ss:$8 sps:$4 sm:$0xff]   ;;  %v1717_v25 = vld [vmem:[#allocation7 + $0x10] ss:$8 sps:$4 sm:$0xff]  }
 0xd51   :  { %1820 = vtanh.f32 %v1026_v26 }
 0xd52   :  { %v1023_v27 = vpop.permute.xlu1 %1022 }
 0xd53   :  { %v1027_v29 = vadd.f32 %v1023_v27, %v1007_v5  ;;  %v1720_v27 = vld [vmem:[#allocation7] ss:$8 sps:$4 sm:$0xff]  }
 0xd55   :  { %1822 = vtanh.f32 %v1027_v29 }
 0xd56   :  { %1824 = vtanh.f32 %v989_v33 }
 0xd57   :  { %1826 = vtanh.f32 %v991_v34 }
 0xd5e   :  { %v1821_v30 = vpop.eup %1820 }
 0xd5f   :  { %1032 = vrot.lane.b32.xlu0 %v1821_v30, %s1954_s3 }
 0xd62   :  { %v1823_v32 = vpop.eup %1822 }
 0xd63   :  { %1034 = vrot.lane.b32.xlu1 %v1823_v32, %s1954_s3  ;;  %v1825_v7 = vpop.eup %1824 }
 0xd64   :  { %v1827_v28 = vpop.eup %1826  ;;  %v997_v35 = vadd.f32 1.0, %v1825_v7 }
 0xd65   :  { %v999_v36 = vadd.f32 1.0, %v1827_v28 }
 0xd66   :  { %v1001_v49 = vmul.f32 0.5, %v997_v35 }
 0xd67   :  { %v1003_v31 = vmul.f32 0.5, %v999_v36 }
 0xdd1   :  { %v1033_v48 = vpop.permute.xlu0 %1032 }
 0xdd2   :  { %v1038_v50 = vmul.f32 %v1033_v48, %v1001_v49 }
 0xdd5   :  { %v1035_v11 = vpop.permute.xlu1 %1034 }
 0xdd6   :  { %v1039_v51 = vmul.f32 %v1035_v11, %v1003_v31 }
 0xdd8   :  { %v1040_v52 = vpack.c.bf16 %v1039_v51, %v1038_v50 }
 0xdda   :  { %1619 = vmatmul.mubr.msk.bf16.vlgmr.msra.gmra.mxu0 %vm397_vm1, %v1040_v52  ;;  %v1266_v52 = vld [vmem:[%s2400_s5] sm:$0x3] }
 0xddb   :  { %1348 = vmatprep.mubr.bf16.mxu0 %v1953_v0  ;;  %1327 = vmatpush1.bf16.msra.mxu0 %v1714_v62  ;;  %v1725_v62 = vld [vmem:[%s2401_s6 + $0x30] sm:$0xff]  }
 0xddc   :  { %1328 = vmatprep.subr.bf16.mxu0 %v1719_v23  ;;  %v1726_v23 = vld [vmem:[%s2401_s6 + $0x28] sm:$0xff]  }
 0xddf   :  { %1329 = vmatpush1.bf16.msra.mxu0 %v1717_v25  ;;  %v1727_v25 = vld [vmem:[%s2401_s6 + $0x20] sm:$0xff]  }
 0xe9a   :  { %v1083_v56 = vpop.f32.mrf.mxu0 }
 0xe9b   :  { %v1092_v54 = vadd.f32 %v1083_v56, %v295_v53  ;;  %v1271_v56 = vrot.slane %v1266_v52, %v97_v18 }
 0xe9c   :  { %v1085_v60 = vpop.f32.mrf.mxu0 }
 0xe9d   :  { %v1093_v61 = vadd.f32 %v1085_v60, %v297_v57  ;;  %v1096_v42 = vmul.f32 0.5, %v1092_v54 }
 0xe9e   :  { %v1087_v55 = vpop.f32.mrf.mxu0 }
 0xe9f   :  { %v1094_v8 = vadd.f32 %v1087_v55, %v299_v4  ;;  %1828 = vtanh.f32 %v1093_v61  ;;  %v1097_v32 = vmul.f32 0.5, %v1093_v61  ;;  %v305_v61 = vadd.f32 %v2237_v44, %v2070_v20 }
 0xea0   :  { %v1089_v0 = vpop.f32.mrf.mxu0 }
 0xea1   :  { %v1095_v10 = vadd.f32 %v1089_v0, %v301_v6  ;;  %v1098_v13 = vmul.f32 0.5, %v1094_v8  ;;  %v307_v6 = vadd.f32 %v2239_v45, %v2076_v24 }
 0xea3   :  { %1830 = vtanh.f32 %v1095_v10  ;;  %v1099_v33 = vmul.f32 0.5, %v1095_v10  ;;  %v309_v10 = vadd.f32 %v2241_v46, %v2070_v20 }
 0xea4   :  { %1832 = vtanh.f32 %v1096_v42 }
 0xea5   :  { %1834 = vtanh.f32 %v1098_v13 }
 0xeac   :  { %v1829_v41 = vpop.eup %1828 }
 0xead   :  { %1118 = vrot.lane.b32.xlu0 %v1829_v41, %s1954_s3 }
 0xeb0   :  { %v1831_v12 = vpop.eup %1830 }
 0xeb1   :  { %1120 = vrot.lane.b32.xlu1 %v1831_v12, %s1954_s3  ;;  %v1833_v2 = vpop.eup %1832  ;;  %v311_v12 = vadd.f32 %v2243_v47, %v2076_v24  ;;  %v1275_v24 = vrot.slane %v1266_v52, %v101_v21 }
 0xeb2   :  { %v1104_v15 = vadd.f32 1.0, %v1833_v2  ;;  %v1835_v1 = vpop.eup %1834 }
 0xeb3   :  { %v1106_v43 = vadd.f32 1.0, %v1835_v1 }
 0xeb4   :  { %v1108_v37 = vmul.f32 0.5, %v1104_v15 }
 0xeb5   :  { %v1110_v58 = vmul.f32 0.5, %v1106_v43 }
 0xeb6   :  { %v1114_v9 = vmul.f32 %v1108_v37, %v1026_v26  ;;  %v1722_v26 = vld [vmem:[#allocation7 + $0x4] ss:$8 sps:$4 sm:$0xff]  }
 0xeb7   :  { %v1115_v14 = vmul.f32 %v1110_v58, %v1027_v29  ;;  %1330 = vmatprep.subr.bf16.mxu0 %v1722_v26  ;;  %v1723_v29 = vld [vmem:[%s2395_s0 + $0x38] sm:$0xff]   ;;  %v1729_v26 = vld [vmem:[%s2401_s6 + $0x10] sm:$0xff]  }
 0xeb8   :  { %1331 = vmatpush1.bf16.msra.mxu0 %v1720_v27 }
 0xebb   :  { %1630 = vmatmul.mubr.msk.bf16.vlgmr.msra.gmra.mxu0 %vm175_vm0, %v1723_v29 }
 0xf1f   :  { %v1119_v3 = vpop.permute.xlu0 %1118 }
 0xf20   :  { %v1124_v38 = vmul.f32 %v1119_v3, %v1108_v37 }
 0xf22   :  { %1128 = vrot.lane.b32.xlu0 %v1124_v38, %s1954_s3 }
 0xf23   :  { %v1121_v39 = vpop.permute.xlu1 %1120 }
 0xf24   :  { %v1125_v59 = vmul.f32 %v1121_v39, %v1110_v58 }
 0xf26   :  { %1130 = vrot.lane.b32.xlu1 %v1125_v59, %s1954_s3  ;;  %v1724_v59 = vld [vmem:[%s2401_s6 + $0x38] sm:$0xff]  }
 0xf7b   :  { %v1350_v53 = vpop.f32.mrf.mxu0 }
 0xf7c   :  { %v2320_v54 = vadd.f32 %v1350_v53, %v1271_v56 }
 0xf7d   :  { %v1352_v57 = vpop.f32.mrf.mxu0 }
 0xf7e   :  { %v1353_v47 = vadd.f32 %v1352_v57, %v1275_v24  ;;  %v1359_v27 = vmul.f32 0.5, %v2320_v54  ;;  %v1731_v57 = vld [vmem:[%s2401_s6] sm:$0xff]  }
 0xf7f   :  { %v1354_v60 = vpop.f32.mrf.mxu0 }
 0xf80   :  { %v2322_v4 = vadd.f32 %v1354_v60, %v1271_v56 }
 0xf81   :  { %v1356_v15 = vpop.f32.mrf.mxu0 }
 0xf82   :  { %v1357_v1 = vadd.f32 %v1356_v15, %v1275_v24 }
 0xf94   :  { %v1129_v63 = vpop.permute.xlu0 %1128 }
 0xf95   :  { %v2302_v40 = vadd.f32 %v1129_v63, %v1114_v9  ;;  %v1955_v63 = vmov 0.0  }
 0xf96   :  { %1652 = vmatprep.subr.bf16.mxu1 %v1955_v63  ;;  %1664 = vmatprep.subr.bf16.mxu0 %v1955_v63 }
 0xf97   :  { %1836 = vtanh.f32 %v2302_v40  ;;  %1672 = vmatprep.mubr.msk.bf16.mxu0 %vm1956_vm2, %v1955_v63 }
 0xf98   :  { %v1131_v16 = vpop.permute.xlu1 %1130 }
 0xf99   :  { %v2305_v19 = vadd.f32 %v1131_v16, %v1115_v14 }
 0xf9b   :  { %1838 = vtanh.f32 %v2305_v19 }
 0xf9c   :  { %1840 = vtanh.f32 %v1097_v32  ;;  %v1360_v32 = vmul.f32 0.5, %v1353_v47 }
 0xf9d   :  { %1842 = vtanh.f32 %v1099_v33 }
 0xfa4   :  { %v1837_v5 = vpop.eup %1836 }
 0xfa5   :  { %1140 = vrot.lane.b32.xlu0 %v1837_v5, %s1954_s3  ;;  %v1728_v5 = vld [vmem:[%s2401_s6 + $0x18] sm:$0xff]  }
 0xfa6   :  { %1665 = vmatpush3.bf16.msra.mxu0 %v1728_v5 }
 0xfa7   :  { %1666 = vmatprep.subr.bf16.mxu0 %v1955_v63 }
 0xfa8   :  { %v1839_v30 = vpop.eup %1838 }
 0xfa9   :  { %1142 = vrot.lane.b32.xlu1 %v1839_v30, %s1954_s3  ;;  %v1841_v34 = vpop.eup %1840  ;;  %v1361_v30 = vmul.f32 0.5, %v2322_v4 }
 0xfaa   :  { %v1843_v7 = vpop.eup %1842  ;;  %v1105_v28 = vadd.f32 1.0, %v1841_v34  ;;  %1667 = vmatpush3.bf16.msra.mxu0 %v1729_v26  ;;  %v1362_v34 = vmul.f32 0.5, %v1357_v1 }
 0xfab   :  { %v1107_v35 = vadd.f32 1.0, %v1843_v7  ;;  %1668 = vmatprep.subr.bf16.mxu0 %v1955_v63 }
 0xfac   :  { %v1109_v48 = vmul.f32 0.5, %v1105_v28 }
 0xfad   :  { %v1111_v49 = vmul.f32 0.5, %v1107_v35 }
0x1017   :  { %v1141_v36 = vpop.permute.xlu0 %1140 }
0x1018   :  { %v1146_v11 = vmul.f32 %v1141_v36, %v1109_v48 }
0x101b   :  { %v1143_v31 = vpop.permute.xlu1 %1142 }
0x101c   :  { %v1147_v50 = vmul.f32 %v1143_v31, %v1111_v49 }
0x101e   :  { %v1148_v51 = vpack.c.bf16 %v1147_v50, %v1146_v11 }
0x1020   :  { %1620 = vmatmul.mubr.msk.bf16.vlgmr.msra.gmra.mxu1 %vm397_vm1, %v1148_v51  ;;  %v1730_v51 = vld [vmem:[%s2401_s6 + $0x8] sm:$0xff]  }
0x1021   :  { %1653 = vmatpush3.bf16.msra.mxu1 %v1724_v59  ;;  %1660 = vmatprep.mubr.msk.bf16.mxu1 %vm1956_vm2, %v1955_v63 }
0x1022   :  { %1654 = vmatprep.subr.bf16.mxu1 %v1955_v63  ;;  %1669 = vmatpush3.bf16.msra.mxu0 %v1730_v51 }
0x1023   :  { %1670 = vmatprep.subr.bf16.mxu0 %v1955_v63 }
0x1025   :  { %1655 = vmatpush3.bf16.msra.mxu1 %v1725_v62 }
0x1026   :  { %1656 = vmatprep.subr.bf16.mxu1 %v1955_v63  ;;  %1671 = vmatpush3.bf16.msra.mxu0 %v1731_v57 }
0x1029   :  { %1657 = vmatpush3.bf16.msra.mxu1 %v1726_v23 }
0x102a   :  { %1658 = vmatprep.subr.bf16.mxu1 %v1955_v63  ;;  %v1641_v63 = vld [vmem:[%s2402_s7] ss:$0 sm:$0xff] }
0x102d   :  { %1659 = vmatpush3.bf16.msra.mxu1 %v1727_v25 }
0x10e0   :  { %v1191_v55 = vpop.f32.mrf.mxu1 }
0x10e1   :  { %v1200_v8 = vadd.f32 %v1191_v55, %v305_v61 }
0x10e2   :  { %v1193_v0 = vpop.f32.mrf.mxu1 }
0x10e3   :  { %v2330_v41 = vadd.f32 %v1193_v0, %v307_v6  ;;  %v1204_v20 = vmul.f32 0.5, %v1200_v8 }
0x10e4   :  { %v1195_v18 = vpop.f32.mrf.mxu1 }
0x10e5   :  { %v1202_v42 = vadd.f32 %v1195_v18, %v309_v10  ;;  %1844 = vtanh.f32 %v2330_v41 }
0x10e6   :  { %v1197_v13 = vpop.f32.mrf.mxu1 }
0x10e7   :  { %v2335_v44 = vadd.f32 %v1197_v13, %v311_v12  ;;  %v1206_v46 = vmul.f32 0.5, %v1202_v42 }
0x10e9   :  { %1846 = vtanh.f32 %v2335_v44 }
0x10ea   :  { %1848 = vtanh.f32 %v1204_v20 }
0x10eb   :  { %1850 = vtanh.f32 %v1206_v46 }
0x10ec   :  { %1852 = vtanh.f32 %v1353_v47 }
0x10ed   :  { %1854 = vtanh.f32 %v1357_v1 }
0x10ee   :  { %1856 = vtanh.f32 %v1359_v27 }
0x10ef   :  { %1858 = vtanh.f32 %v1361_v30 }
0x10f0   :  { %1860 = vtanh.f32 %v1360_v32 }
0x10f1   :  { %1862 = vtanh.f32 %v1362_v34 }
0x10f2   :  { %v1845_v45 = vpop.eup %1844 }
0x10f3   :  { %1226 = vrot.lane.b32.xlu0 %v1845_v45, %s1954_s3  ;;  %v1205_v45 = vmul.f32 0.5, %v2330_v41 }
0x10f6   :  { %v1847_v2 = vpop.eup %1846 }
0x10f7   :  { %1228 = vrot.lane.b32.xlu1 %v1847_v2, %s1954_s3  ;;  %v1849_v37 = vpop.eup %1848  ;;  %v1207_v2 = vmul.f32 0.5, %v2335_v44 }
0x10f8   :  { %v1212_v43 = vadd.f32 1.0, %v1849_v37  ;;  %v1851_v3 = vpop.eup %1850 }
0x10f9   :  { %v1214_v58 = vadd.f32 1.0, %v1851_v3  ;;  %v1853_v21 = vpop.eup %1852 }
0x10fa   :  { %v1216_v38 = vmul.f32 0.5, %v1212_v43  ;;  %v1855_v22 = vpop.eup %1854 }
0x10fb   :  { %v1218_v17 = vmul.f32 0.5, %v1214_v58  ;;  %v1857_v29 = vpop.eup %1856 }
0x10fc   :  { %v1367_v33 = vadd.f32 1.0, %v1857_v29  ;;  %v1222_v7 = vmul.f32 %v1216_v38, %v2302_v40  ;;  %v1859_v28 = vpop.eup %1858 }
0x10fd   :  { %v1223_v49 = vmul.f32 %v1218_v17, %v2305_v19  ;;  %v1369_v31 = vadd.f32 1.0, %v1859_v28  ;;  %v1861_v54 = vpop.eup %1860 }
0x10fe   :  { %v1371_v48 = vmul.f32 0.5, %v1367_v33  ;;  %v1863_v60 = vpop.eup %1862  ;;  %v1368_v4 = vadd.f32 1.0, %v1861_v54 }
0x10ff   :  { %v1373_v40 = vmul.f32 0.5, %v1369_v31  ;;  %v1370_v6 = vadd.f32 1.0, %v1863_v60 }
0x1100   :  { %v1372_v55 = vmul.f32 0.5, %v1368_v4 }
0x1101   :  { %v1374_v18 = vmul.f32 0.5, %v1370_v6 }
0x1165   :  { %v1227_v39 = vpop.permute.xlu0 %1226 }
0x1166   :  { %v1232_v9 = vmul.f32 %v1227_v39, %v1216_v38 }
0x1168   :  { %1236 = vrot.lane.b32.xlu0 %v1232_v9, %s1954_s3 }
0x1169   :  { %v1229_v14 = vpop.permute.xlu1 %1228 }
0x116a   :  { %v1233_v16 = vmul.f32 %v1229_v14, %v1218_v17 }
0x116c   :  { %1379 = vrot.lane.b32.xlu0 %v1853_v21, %s1954_s3  ;;  %1238 = vrot.lane.b32.xlu1 %v1233_v16, %s1954_s3 }
0x1170   :  { %1381 = vrot.lane.b32.xlu1 %v1855_v22, %s1954_s3 }
0x11da   :  { %v1237_v35 = vpop.permute.xlu0 %1236 }
0x11db   :  { %v1242_v36 = vadd.f32 %v1237_v35, %v1222_v7 }
0x11dd   :  { %1864 = vtanh.f32 %v1242_v36 }
0x11de   :  { %v1380_v11 = vpop.permute.xlu0 %1379  ;;  %v1239_v50 = vpop.permute.xlu1 %1238 }
0x11df   :  { %v1385_v52 = vmul.f32 %v1380_v11, %v1371_v48  ;;  %v1243_v53 = vadd.f32 %v1239_v50, %v1223_v49 }
0x11e1   :  { %1866 = vtanh.f32 %v1385_v52 }
0x11e2   :  { %1868 = vtanh.f32 %v1243_v53  ;;  %v1382_v56 = vpop.permute.xlu1 %1381 }
0x11e3   :  { %v1386_v19 = vmul.f32 %v1382_v56, %v1373_v40 }
0x11e5   :  { %1870 = vtanh.f32 %v1386_v19 }
0x11e6   :  { %1872 = vtanh.f32 %v1205_v45 }
0x11e7   :  { %1874 = vtanh.f32 %v1207_v2 }
0x11ea   :  { %v1865_v61 = vpop.eup %1864 }
0x11eb   :  { %1248 = vrot.lane.b32.xlu0 %v1865_v61, %s1954_s3 }
0x11ee   :  { %v1867_v8 = vpop.eup %1866 }
0x11ef   :  { %v1869_v0 = vpop.eup %1868  ;;  %v1389_v10 = vmul.f32 %v1867_v8, %v1372_v55 }
0x11f0   :  { %1250 = vrot.lane.b32.xlu1 %v1869_v0, %s1954_s3 }
0x11f2   :  { %v1871_v12 = vpop.eup %1870 }
0x11f3   :  { %v1390_v42 = vmul.f32 %v1871_v12, %v1374_v18  ;;  %v1873_v20 = vpop.eup %1872 }
0x11f4   :  { %v1875_v46 = vpop.eup %1874  ;;  %v1213_v24 = vadd.f32 1.0, %v1873_v20 }
0x11f5   :  { %v1391_v13 = vpack.c.bf16 %v1390_v42, %v1389_v10  ;;  %v1215_v47 = vadd.f32 1.0, %v1875_v46 }
0x11f6   :  { %v1217_v1 = vmul.f32 0.5, %v1213_v24 }
0x11f7   :  { %1661 = vmatmul.mubr.msk.bf16.vlgmr.msra.gmra.mxu1 %vm397_vm1, %v1391_v13  ;;  %v1219_v37 = vmul.f32 0.5, %v1215_v47 }
0x125d   :  { %v1249_v15 = vpop.permute.xlu0 %1248 }
0x125e   :  { %v1254_v3 = vmul.f32 %v1249_v15, %v1217_v1 }
0x1262   :  { %v1251_v43 = vpop.permute.xlu1 %1250 }
0x1263   :  { %v1255_v38 = vmul.f32 %v1251_v43, %v1219_v37 }
0x1265   :  { %v1256_v58 = vpack.c.bf16 %v1255_v38, %v1254_v3 }
0x1267   :  { %1673 = vmatmul.mubr.msk.bf16.vlgmr.msra.gmra.mxu0 %vm397_vm1, %v1256_v58 }
0x12b7   :  { %v1469_v39 = vpop.f32.mrf.mxu1 }
0x12b9   :  { %v1662_v59 = vpop.f32.mrf.mxu1 }
0x12bb   :  { %v1472_v41 = vpop.f32.mrf.mxu1 }
0x12bd   :  { %v1663_v9 = vpop.f32.mrf.mxu1 }
0x1327   :  { %v1537_v44 = vpop.f32.mrf.mxu0 }
0x1328   :  { %v1538_v17 = vadd.f32 %v1537_v44, %v1469_v39 }
0x1329   :  { %v1674_v21 = vpop.f32.mrf.mxu0 }
0x132a   :  { %v1551_v14 = vadd.f32 %v1641_v63, %v1538_v17 }
0x132b   :  { %v1540_v16 = vpop.f32.mrf.mxu0 }
0x132c   :  { %v1541_v62 = vadd.f32 %v1540_v16, %v1472_v41  ;;  %v1554_v22 = vsel %vm1553_vm3, %v1551_v14, -inf }
0x132d   :  { %1555 = vmax.xlane.f32.xlu0 %v1554_v22  ;;  %v1675_v23 = vpop.f32.mrf.mxu0 }
0x132e   :  { %v1552_v25 = vadd.f32 %v1641_v63, %v1541_v62 }
0x1330   :  { %v1557_v5 = vsel %vm1553_vm3, %v1552_v25, -inf }
0x1331   :  { %1558 = vmax.xlane.f32.xlu1 %v1557_v5 }
0x13b6   :  { %v1556_v26 = vpop.xlane.xlu0 %1555 }
0x13b7   :  { %v1560_v27 = vsub.f32 %v1551_v14, %v1556_v26 }
0x13b9   :  { %v1562_v30 = vmul.f32 1.442695, %v1560_v27 }
0x13ba   :  { %v1559_v29 = vpop.xlane.xlu1 %1558 }
0x13bb   :  { %1876 = vpow2.f32 %v1562_v30  ;;  %v1561_v32 = vsub.f32 %v1552_v25, %v1559_v29 }
0x13bd   :  { %v1564_v33 = vmul.f32 1.442695, %v1561_v32 }
0x13bf   :  { %1878 = vpow2.f32 %v1564_v33 }
0x13c8   :  { %v1877_v34 = vpop.eup %1876 }
0x13c9   :  { %v1566_v7 = vsel %vm1553_vm3, %v1877_v34, 0.0 }
0x13ca   :  { %1567 = vadd.xlane.f32.xlu0 %v1566_v7 }
0x13cc   :  { %v1879_v28 = vpop.eup %1878 }
0x13cd   :  { %v1569_v35 = vsel %vm1553_vm3, %v1879_v28, 0.0 }
0x13ce   :  { %1570 = vadd.xlane.f32.xlu0 %v1569_v35 }
0x1453   :  { %v1568_v36 = vpop.xlane.xlu0 %1567 }
0x1454   :  { %1880 = vrcp.f32 %v1568_v36 }
0x1457   :  { %v1571_v48 = vpop.xlane.xlu0 %1570 }
0x1458   :  { %1882 = vrcp.f32 %v1571_v48 }
0x1461   :  { %v1881_v49 = vpop.eup %1880 }
0x1462   :  { %v1574_v31 = vmul.f32 %v1881_v49, %v1877_v34 }
0x1464   :  { %1576 = vst.msk [vmem:[%s2403_s8] sm:$0xff] %vm1553_vm3, %v1574_v31 }
0x1465   :  { %v1883_v11 = vpop.eup %1882 }
0x1466   :  { %v1575_v50 = vmul.f32 %v1883_v11, %v1879_v28 }
0x1468   :  { %1577 = vst.msk [vmem:[%s2403_s8 + $0x8] sm:$0xff] %vm1553_vm3, %v1575_v50 }
0x1469   :  { %1582 = vsyncpa [#allocation4], 1 }
0x146a   :  { %1583 = vsyncpa [#allocation6], 1 }

</bundles_post_ra>
